<compile_context>
chip_gen: v5e
topology: v5e:2x2
jax: 0.10.0
libtpu: 0.0.40
codegen_flags: <defaults>
</compile_context>

<pallas_src>
import math
import numpy as np
import jax
import jax.numpy as jnp
from jax import lax
from jax.experimental import pallas as pl
from jax.experimental.pallas import tpu as pltpu

_HALF_PI = math.pi / 2.0


# ---------------------------------------------------------------------------
# helpers mirroring the PyTorch module
# ---------------------------------------------------------------------------
def calc_ind(s, e):
    if s == 0:
        start_ind = 0
    else:
        start_ind = 4 * (s - 1) * (s - 1) + 4 * (s - 1) + 1
    end_ind = 4 * e * e + 4 * e + 1
    return start_ind, end_ind, end_ind - start_ind


def build_basis_table(all_freq):
    """Enumerate the Embedder basis fns in the exact PyTorch order.
    Each basis fn is cos(fx*x - phx) * cos(fy*y - phy). Returns rows (fx,phx,fy,phy)."""
    H = _HALF_PI
    rows = [(0.0, 0.0, 0.0, 0.0)]                      # constant 1
    pf = [(0.0, 0.0), (0.0, H), (H, 0.0), (H, H)]      # cos*cos, cos*sin, sin*cos, sin*sin
    for f in range(1, all_freq + 1):
        rows.append((float(f), H, 0.0, 0.0))           # sin(x*f)
        rows.append((float(f), 0.0, 0.0, 0.0))         # cos(x*f)
        rows.append((0.0, 0.0, float(f), H))           # sin(y*f)
        rows.append((0.0, 0.0, float(f), 0.0))         # cos(y*f)
        for ft in range(1, f):
            for (px, py) in pf:
                rows.append((float(f), px, float(ft), py))
                rows.append((float(ft), px, float(f), py))
        for (px, py) in pf:
            rows.append((float(f), px, float(f), py))
    return rows


def _factor_index(freq, phase):
    """Map (freq, phase) of one cos factor to its row in the small factor table."""
    f = int(round(freq))
    if f == 0:
        return 0                      # cos(0) == 1
    return 2 * f if phase != 0.0 else 2 * f - 1   # sin(f t) / cos(f t)


# ---------------------------------------------------------------------------
# Pallas kernel
# ---------------------------------------------------------------------------
def _fourier_render_kernel(coords_ref, fac_ref, sx_ref, sy_ref, feat_ref, out_ref):
    coords = coords_ref[...]                       # (3, TQ) f32: x, y, idx-as-float
    x = coords[0:1, :]                             # (1, TQ)
    y = coords[1:2, :]
    idx = coords[2:3, :].astype(jnp.int32)         # exact: idx < 2^24

    # factorized Fourier basis: small cos/sin tables on the EUP, expanded on the MXU
    freqs = fac_ref[:, 0:1]                        # (NF, 1)
    phases = fac_ref[:, 1:2]
    cx = jnp.cos(freqs * x - phases)               # (NF, TQ)
    cy = jnp.cos(freqs * y - phases)               # (NF, TQ)
    basis = (jnp.dot(sx_ref[...], cx, preferred_element_type=jnp.float32) *
             jnp.dot(sy_ref[...], cy, preferred_element_type=jnp.float32))   # (dms_pad, TQ)

    feat_b = feat_ref[0]                           # (3*dms_pad, P) bf16, resident per batch
    c3p, p = feat_b.shape
    dms_pad = c3p // 3
    tq = x.shape[1]

    # nearest-neighbour grid_sample: single one-hot gather matmul on the MXU
    onehot = (lax.broadcasted_iota(jnp.int32, (p, tq), 0) == idx).astype(jnp.bfloat16)
    g = jnp.dot(feat_b, onehot, preferred_element_type=jnp.float32)   # (3*dms_pad, TQ)

    # fourier_series multiply + per-colour dms reductions (slices are 16-aligned)
    f_rgb = []
    for cc in range(3):
        gq = g[cc * dms_pad:(cc + 1) * dms_pad, :]                    # (dms_pad, TQ)
        f_rgb.append(jnp.sum(gq * basis, axis=0, keepdims=True))      # (1, TQ)

    row = lax.broadcasted_iota(jnp.int32, (3, tq), 0)
    out_ref[0] = jnp.where(row == 0, f_rgb[0],
                           jnp.where(row == 1, f_rgb[1], f_rgb[2]))   # (3, TQ) dense store


# ---------------------------------------------------------------------------
# wrapper (== Fourier_render_patch.forward)
# ---------------------------------------------------------------------------
def fourier_render_patch(feat, h, w, s, e, *, all_freq, omega, tile_q=512):
    n, c, hf, wf = feat.shape
    start_ind, end_ind, dms = calc_ind(s, e)
    assert c == 3 * dms
    assert tile_q % 128 == 0
    q = h * w
    p_cells = hf * wf
    assert p_cells < (1 << 24)                      # idx carried exactly as f32

    dms_pad = ((dms + 15) // 16) * 16               # bf16 sublane tile & aligned slices
    c3p = 3 * dms_pad

    # ---- glue: make_coord for the output grid, nearest feature cell, rel coords
    ch = -1.0 + 1.0 / h + (2.0 / h) * jnp.arange(h, dtype=jnp.float32)
    cw = -1.0 + 1.0 / w + (2.0 / w) * jnp.arange(w, dtype=jnp.float32)
    coord_h = jnp.repeat(ch, w)                     # (Q,) row-major (i*w + j)
    coord_w = jnp.tile(cw, h)
    eps = 1e-6
    cl_h = jnp.clip(coord_h, -1 + eps, 1 - eps)
    cl_w = jnp.clip(coord_w, -1 + eps, 1 - eps)
    # F.grid_sample(mode='nearest', align_corners=False) index rule
    # (round-half-to-even; may differ from torch at exact .5 ties)
    iy = jnp.clip(jnp.round(((cl_h + 1.0) * hf - 1.0) * 0.5).astype(jnp.int32), 0, hf - 1)
    ix = jnp.clip(jnp.round(((cl_w + 1.0) * wf - 1.0) * 0.5).astype(jnp.int32), 0, wf - 1)
    qh = -1.0 + 1.0 / hf + (2.0 / hf) * iy.astype(jnp.float32)
    qw = -1.0 + 1.0 / wf + (2.0 / wf) * ix.astype(jnp.float32)
    xarg = (coord_h - qh) * hf * omega              # rel_coord[...,0]*Hf, scaled by omega
    yarg = (coord_w - qw) * wf * omega              # rel_coord[...,1]*Wf, scaled by omega
    idx = iy * wf + ix                              # flat nearest-cell index

    # ---- glue: factorized basis tables for the Embedder slice [start_ind, end_ind)
    rows = build_basis_table(all_freq)[start_ind:end_ind]
    nfac = 2 * all_freq + 1
    nfac_pad = ((nfac + 7) // 8) * 8
    fac_np = np.zeros((nfac_pad, 2), np.float32)    # rows: (freq, phase); row 0 = const 1
    for f in range(1, all_freq + 1):
        fac_np[2 * f - 1] = (float(f), 0.0)         # cos(f*t)
        fac_np[2 * f] = (float(f), _HALF_PI)        # sin(f*t)
    sx_np = np.zeros((dms_pad, nfac_pad), np.float32)
    sy_np = np.zeros((dms_pad, nfac_pad), np.float32)
    for d, (fx, phx, fy, phy) in enumerate(rows):
        sx_np[d, _factor_index(fx, phx)] = 1.0
        sy_np[d, _factor_index(fy, phy)] = 1.0
    fac = jnp.asarray(fac_np)
    sx = jnp.asarray(sx_np)
    sy = jnp.asarray(sy_np)

    # ---- pack the three query streams as one lane-dense (3, Q) array, pad to tile_q
    qp = ((q + tile_q - 1) // tile_q) * tile_q
    pad = qp - q
    coords = jnp.stack([xarg, yarg, idx.astype(jnp.float32)], axis=0)
    coords = jnp.pad(coords, ((0, 0), (0, pad)))

    # ---- feat: channel-major (no HBM transpose), per-colour blocks zero-padded, bf16
    feat_k = feat.astype(jnp.float32).reshape(n, 3, dms, p_cells)
    feat_k = jnp.pad(feat_k, ((0, 0), (0, 0), (0, dms_pad - dms), (0, 0)))
    feat_k = feat_k.reshape(n, c3p, p_cells).astype(jnp.bfloat16)

    # explicit VMEM budget (v5e: 16 MiB scoped default; v7x: 64 MiB physical)
    est = (2 * c3p * p_cells * 2            # feat block, double-buffered (bf16)
           + 4 * 3 * tile_q * 4             # coords in + out, double-buffered
           + p_cells * tile_q * 2           # one-hot temporary (bf16)
           + 16 * dms_pad * tile_q * 4      # g / basis / series temporaries
           + (4 << 20))
    vmem_limit = int(min(max(est, 16 << 20), 48 << 20))

    out = pl.pallas_call(
        _fourier_render_kernel,
        out_shape=jax.ShapeDtypeStruct((n, 3, qp), jnp.float32),
        grid_spec=pltpu.PrefetchScalarGridSpec(
            num_scalar_prefetch=0,
            grid=(n, qp // tile_q),
            in_specs=[
                pl.BlockSpec((3, tile_q), lambda b, t: (0, t)),           # packed x/y/idx
                pl.BlockSpec((nfac_pad, 2), lambda b, t: (0, 0)),         # (freq, phase) factors
                pl.BlockSpec((dms_pad, nfac_pad), lambda b, t: (0, 0)),   # x-factor selection
                pl.BlockSpec((dms_pad, nfac_pad), lambda b, t: (0, 0)),   # y-factor selection
                pl.BlockSpec((1, c3p, p_cells), lambda b, t: (b, 0, 0)),  # feat, resident per b
            ],
            out_specs=pl.BlockSpec((1, 3, tile_q), lambda b, t: (b, 0, t)),
        ),
        compiler_params=pltpu.CompilerParams(
            dimension_semantics=("parallel", "parallel"),
            vmem_limit_bytes=vmem_limit),
    )(coords, fac, sx, sy, feat_k)

    # pred.view(N, h, w, 3).permute(0, 3, 1, 2) == reshape only (layout already NC(hw))
    return out[:, :, :q].reshape(n, 3, h, w)


# ---------------------------------------------------------------------------
# pure-numpy reference mirroring the torch code (for in-script verification)
# ---------------------------------------------------------------------------
def reference_forward(feat, h, w, s, e, all_freq, omega):
    feat = np.asarray(feat, dtype=np.float64)
    n, c, hf, wf = feat.shape
    start_ind, end_ind, dms = calc_ind(s, e)
    ch = -1.0 + 1.0 / h + (2.0 / h) * np.arange(h)
    cw = -1.0 + 1.0 / w + (2.0 / w) * np.arange(w)
    coord = np.stack(np.meshgrid(ch, cw, indexing='ij'), axis=-1).reshape(-1, 2)
    cc = np.clip(coord, -1 + 1e-6, 1 - 1e-6)
    iy = np.clip(np.rint(((cc[:, 0] + 1.0) * hf - 1.0) / 2.0).astype(np.int64), 0, hf - 1)
    ix = np.clip(np.rint(((cc[:, 1] + 1.0) * wf - 1.0) / 2.0).astype(np.int64), 0, wf - 1)
    qh = -1.0 + 1.0 / hf + (2.0 / hf) * iy
    qw = -1.0 + 1.0 / wf + (2.0 / wf) * ix
    x = (coord[:, 0] - qh) * hf * omega
    y = (coord[:, 1] - qw) * wf * omega
    pfns = [lambda a, b: np.cos(a) * np.cos(b),
            lambda a, b: np.cos(a) * np.sin(b),
            lambda a, b: np.sin(a) * np.cos(b),
            lambda a, b: np.sin(a) * np.sin(b)]
    cols = [np.ones_like(x)]
    for f in range(1, all_freq + 1):
        cols += [np.sin(x * f), np.cos(x * f), np.sin(y * f), np.cos(y * f)]
        for ft in range(1, f):
            for pf in pfns:
                cols.append(pf(x * f, y * ft))
                cols.append(pf(x * ft, y * f))
        for pf in pfns:
            cols.append(pf(x * f, y * f))
    basis = np.stack(cols, axis=-1)[:, start_ind:end_ind]        # (Q, dms)
    proj = feat[:, :, iy, ix].transpose(0, 2, 1)                 # (N, Q, 3*dms)
    series = proj * np.tile(basis[None], (1, 1, 3))
    f_r = series[:, :, :dms].sum(-1)
    f_g = series[:, :, dms:2 * dms].sum(-1)
    f_b = series[:, :, 2 * dms:].sum(-1)
    return np.stack([f_r, f_g, f_b], axis=-1).reshape(n, h, w, 3).transpose(0, 3, 1, 2)


if __name__ == "__main__":
    key = jax.random.PRNGKey(0)
    all_freq, omega = 2, math.pi
    n, hf, wf = 2, 8, 8
    h, w = 16, 16

    # second case uses tile_q=128 to exercise the multi-tile query grid axis
    for (s, e), tq in [((0, all_freq), 512), ((1, all_freq), 128)]:
        _, _, dms = calc_ind(s, e)
        c = 3 * dms
        key, sub = jax.random.split(key)
        feat = jax.random.normal(sub, (n, c, hf, wf), dtype=jnp.float32)
        out = fourier_render_patch(feat, h, w, s, e,
                                   all_freq=all_freq, omega=omega, tile_q=tq)
        out = jax.block_until_ready(out)
        assert out.shape == (n, 3, h, w)
        ref = reference_forward(np.asarray(feat), h, w, s, e, all_freq, omega)
        # feat is rounded to bf16 for the MXU gather, so compare with a
        # scale-normalized bound rather than a tight per-element atol.
        err = float(np.max(np.abs(np.asarray(out) - ref)))
        scale = float(np.max(np.abs(ref)))
        assert err <= 2e-2 * scale + 1e-3, f"max|err|={err:.4g} scale={scale:.4g}"

    print("KERNEL_OK")
</pallas_src>

<mosaic_0001>
module attributes {stable_mosaic.version = 11 : i64} {
  func.func @_fourier_render_kernel(%arg0: i32, %arg1: i32, %arg2: memref<3x512xf32, #tpu.memory_space<vmem>>, %arg3: memref<8x2xf32, #tpu.memory_space<vmem>>, %arg4: memref<32x8xf32, #tpu.memory_space<vmem>>, %arg5: memref<32x8xf32, #tpu.memory_space<vmem>>, %arg6: memref<1x96x64xbf16, #tpu.memory_space<vmem>>, %arg7: memref<1x3x512xf32, #tpu.memory_space<vmem>>) attributes {dimension_semantics = [#tpu.dimension_semantics<parallel>, #tpu.dimension_semantics<parallel>], iteration_bounds = array<i64: 2, 1>, scalar_prefetch = 0 : i64, scratch_operands = 0 : i64, tpu.core_type = #tpu.core_type<tc>, window_params = [{transform_indices = @transform_0, window_bounds = array<i64: 3, 512>}, {pipeline_mode = #tpu.pipeline_mode<synchronous>, transform_indices = @transform_1, window_bounds = array<i64: 8, 2>}, {pipeline_mode = #tpu.pipeline_mode<synchronous>, transform_indices = @transform_2, window_bounds = array<i64: 32, 8>}, {pipeline_mode = #tpu.pipeline_mode<synchronous>, transform_indices = @transform_3, window_bounds = array<i64: 32, 8>}, {transform_indices = @transform_4, window_bounds = array<i64: 1, 96, 64>}, {transform_indices = @transform_5, window_bounds = array<i64: 1, 3, 512>}]} {
    %c0 = arith.constant 0 : index
    %c0_0 = arith.constant 0 : index
    %0 = vector.load %arg2[%c0, %c0_0] : memref<3x512xf32, #tpu.memory_space<vmem>>, vector<3x512xf32>
    %1 = vector.extract_strided_slice %0 {offsets = [0, 0], sizes = [1, 512], strides = [1, 1]} : vector<3x512xf32> to vector<1x512xf32>
    %2 = vector.extract_strided_slice %0 {offsets = [1, 0], sizes = [1, 512], strides = [1, 1]} : vector<3x512xf32> to vector<1x512xf32>
    %3 = vector.extract_strided_slice %0 {offsets = [2, 0], sizes = [1, 512], strides = [1, 1]} : vector<3x512xf32> to vector<1x512xf32>
    %4 = arith.fptosi %3 : vector<1x512xf32> to vector<1x512xi32>
    %c0_1 = arith.constant 0 : index
    %c0_2 = arith.constant 0 : index
    %5 = vector.load %arg3[%c0_1, %c0_2] : memref<8x2xf32, #tpu.memory_space<vmem>>, vector<8x1xf32>
    %c0_3 = arith.constant 0 : index
    %c1 = arith.constant 1 : index
    %6 = vector.load %arg3[%c0_3, %c1] : memref<8x2xf32, #tpu.memory_space<vmem>>, vector<8x1xf32>
    %7 = vector.broadcast %5 : vector<8x1xf32> to vector<8x512xf32>
    %8 = vector.broadcast %1 : vector<1x512xf32> to vector<8x512xf32>
    %9 = arith.mulf %7, %8 : vector<8x512xf32>
    %10 = vector.broadcast %6 : vector<8x1xf32> to vector<8x512xf32>
    %11 = arith.subf %9, %10 : vector<8x512xf32>
    %12 = math.cos %11 : vector<8x512xf32>
    %13 = vector.broadcast %5 : vector<8x1xf32> to vector<8x512xf32>
    %14 = vector.broadcast %2 : vector<1x512xf32> to vector<8x512xf32>
    %15 = arith.mulf %13, %14 : vector<8x512xf32>
    %16 = vector.broadcast %6 : vector<8x1xf32> to vector<8x512xf32>
    %17 = arith.subf %15, %16 : vector<8x512xf32>
    %18 = math.cos %17 : vector<8x512xf32>
    %c0_4 = arith.constant 0 : index
    %c0_5 = arith.constant 0 : index
    %19 = vector.load %arg4[%c0_4, %c0_5] : memref<32x8xf32, #tpu.memory_space<vmem>>, vector<32x8xf32>
    %cst = arith.constant dense<0.000000e+00> : vector<32x512xf32>
    %20 = tpu.matmul %19, %12, %cst {dimension_numbers = #tpu.dot_dimension_numbers<[1], [0], [0], [1], [0, 0, 1, 1], [], []>} : vector<32x8xf32>, vector<8x512xf32>, vector<32x512xf32> -> vector<32x512xf32>
    %c0_6 = arith.constant 0 : index
    %c0_7 = arith.constant 0 : index
    %21 = vector.load %arg5[%c0_6, %c0_7] : memref<32x8xf32, #tpu.memory_space<vmem>>, vector<32x8xf32>
    %cst_8 = arith.constant dense<0.000000e+00> : vector<32x512xf32>
    %22 = tpu.matmul %21, %18, %cst_8 {dimension_numbers = #tpu.dot_dimension_numbers<[1], [0], [0], [1], [0, 0, 1, 1], [], []>} : vector<32x8xf32>, vector<8x512xf32>, vector<32x512xf32> -> vector<32x512xf32>
    %23 = arith.mulf %20, %22 : vector<32x512xf32>
    %c0_9 = arith.constant 0 : index
    %c0_10 = arith.constant 0 : index
    %c0_11 = arith.constant 0 : index
    %24 = vector.load %arg6[%c0_9, %c0_10, %c0_11] : memref<1x96x64xbf16, #tpu.memory_space<vmem>>, vector<1x96x64xbf16>
    %25 = vector.shape_cast %24 : vector<1x96x64xbf16> to vector<96x64xbf16>
    %26 = tpu.iota {dimensions = array<i32: 0>} : vector<64x512xi32>
    %27 = vector.broadcast %4 : vector<1x512xi32> to vector<64x512xi32>
    %28 = arith.cmpi eq, %26, %27 : vector<64x512xi32>
    %29 = arith.extui %28 : vector<64x512xi1> to vector<64x512xi32>
    %30 = arith.sitofp %29 : vector<64x512xi32> to vector<64x512xf32>
    %31 = arith.truncf %30 : vector<64x512xf32> to vector<64x512xbf16>
    %cst_12 = arith.constant dense<0.000000e+00> : vector<96x512xf32>
    %32 = tpu.matmul %25, %31, %cst_12 {dimension_numbers = #tpu.dot_dimension_numbers<[1], [0], [0], [1], [0, 0, 1, 1], [], []>} : vector<96x64xbf16>, vector<64x512xbf16>, vector<96x512xf32> -> vector<96x512xf32>
    %33 = vector.extract_strided_slice %32 {offsets = [0, 0], sizes = [32, 512], strides = [1, 1]} : vector<96x512xf32> to vector<32x512xf32>
    %34 = arith.mulf %33, %23 : vector<32x512xf32>
    %cst_13 = arith.constant dense<0.000000e+00> : vector<512xf32>
    %35 = vector.multi_reduction <add>, %34, %cst_13 [0] : vector<32x512xf32> to vector<512xf32>
    %36 = vector.shape_cast %35 : vector<512xf32> to vector<1x512xf32>
    %37 = vector.extract_strided_slice %32 {offsets = [32, 0], sizes = [32, 512], strides = [1, 1]} : vector<96x512xf32> to vector<32x512xf32>
    %38 = arith.mulf %37, %23 : vector<32x512xf32>
    %cst_14 = arith.constant dense<0.000000e+00> : vector<512xf32>
    %39 = vector.multi_reduction <add>, %38, %cst_14 [0] : vector<32x512xf32> to vector<512xf32>
    %40 = vector.shape_cast %39 : vector<512xf32> to vector<1x512xf32>
    %41 = vector.extract_strided_slice %32 {offsets = [64, 0], sizes = [32, 512], strides = [1, 1]} : vector<96x512xf32> to vector<32x512xf32>
    %42 = arith.mulf %41, %23 : vector<32x512xf32>
    %cst_15 = arith.constant dense<0.000000e+00> : vector<512xf32>
    %43 = vector.multi_reduction <add>, %42, %cst_15 [0] : vector<32x512xf32> to vector<512xf32>
    %44 = vector.shape_cast %43 : vector<512xf32> to vector<1x512xf32>
    %45 = tpu.iota {dimensions = array<i32: 0>} : vector<3x512xi32>
    %c0_i32 = arith.constant 0 : i32
    %46 = vector.broadcast %c0_i32 : i32 to vector<3x512xi32>
    %47 = arith.cmpi eq, %45, %46 : vector<3x512xi32>
    %c1_i32 = arith.constant 1 : i32
    %48 = vector.broadcast %c1_i32 : i32 to vector<3x512xi32>
    %49 = arith.cmpi eq, %45, %48 : vector<3x512xi32>
    %50 = vector.shape_cast %40 : vector<1x512xf32> to vector<1x512xf32>
    %51 = vector.broadcast %50 : vector<1x512xf32> to vector<3x512xf32>
    %52 = vector.shape_cast %44 : vector<1x512xf32> to vector<1x512xf32>
    %53 = vector.broadcast %52 : vector<1x512xf32> to vector<3x512xf32>
    %54 = arith.select %49, %51, %53 : vector<3x512xi1>, vector<3x512xf32>
    %55 = vector.shape_cast %36 : vector<1x512xf32> to vector<1x512xf32>
    %56 = vector.broadcast %55 : vector<1x512xf32> to vector<3x512xf32>
    %57 = arith.select %47, %56, %54 : vector<3x512xi1>, vector<3x512xf32>
    %c0_16 = arith.constant 0 : index
    %c0_17 = arith.constant 0 : index
    %c0_18 = arith.constant 0 : index
    %58 = vector.load %arg7[%c0_16, %c0_17, %c0_18] : memref<1x3x512xf32, #tpu.memory_space<vmem>>, vector<1x3x512xf32>
    %59 = vector.shape_cast %58 : vector<1x3x512xf32> to vector<3x512xf32>
    %60 = vector.shape_cast %57 : vector<3x512xf32> to vector<1x3x512xf32>
    tpu.vector_store %arg7[%c0_16, %c0_17, %c0_18], %60 {strides = array<i32>} : memref<1x3x512xf32, #tpu.memory_space<vmem>>, vector<1x3x512xf32>,
    return
  }
  func.func @transform_0(%arg0: i32, %arg1: i32) -> (i32, i32) {
    %c0_i32 = arith.constant 0 : i32
    %c0_i32_0 = arith.constant 0 : i32
    return %c0_i32, %arg1 : i32, i32
  }
  func.func @transform_1(%arg0: i32, %arg1: i32) -> (i32, i32) {
    %c0_i32 = arith.constant 0 : i32
    %c0_i32_0 = arith.constant 0 : i32
    %c0_i32_1 = arith.constant 0 : i32
    return %c0_i32, %c0_i32_0 : i32, i32
  }
  func.func @transform_2(%arg0: i32, %arg1: i32) -> (i32, i32) {
    %c0_i32 = arith.constant 0 : i32
    %c0_i32_0 = arith.constant 0 : i32
    %c0_i32_1 = arith.constant 0 : i32
    return %c0_i32, %c0_i32_0 : i32, i32
  }
  func.func @transform_3(%arg0: i32, %arg1: i32) -> (i32, i32) {
    %c0_i32 = arith.constant 0 : i32
    %c0_i32_0 = arith.constant 0 : i32
    %c0_i32_1 = arith.constant 0 : i32
    return %c0_i32, %c0_i32_0 : i32, i32
  }
  func.func @transform_4(%arg0: i32, %arg1: i32) -> (i32, i32, i32) {
    %c0_i32 = arith.constant 0 : i32
    %c0_i32_0 = arith.constant 0 : i32
    %c0_i32_1 = arith.constant 0 : i32
    return %arg0, %c0_i32, %c0_i32_0 : i32, i32, i32
  }
  func.func @transform_5(%arg0: i32, %arg1: i32) -> (i32, i32, i32) {
    %c0_i32 = arith.constant 0 : i32
    %c0_i32_0 = arith.constant 0 : i32
    return %arg0, %c0_i32, %arg1 : i32, i32, i32
  }
}

</mosaic_0001>

<bundles_post_ra>
// kernel: tpu_custom_call.1
= control target key start
LH: loop header
LB: loop body
LE: loop exit
PB: predicated region body
PF: predicated region fallthrough
CT: control target
= control target key end

     0   :  { %s2760_s18 = smov 0   ;;  %s2762_s19 = smov 0   ;;  %s4076_s0 = inlined_call_operand.vmem [shape: f32[3,512], index: 0, kind: input, shape index: {}]   ;;  %s4077_s1 = inlined_call_operand.vmem [shape: f32[8,2], index: 1, kind: input, shape index: {}]   ;;  %s4078_s2 = inlined_call_operand.vmem [shape: f32[32,8], index: 2, kind: input, shape index: {}]   ;;  %s4079_s3 = inlined_call_operand.vmem [shape: f32[32,8], index: 3, kind: input, shape index: {}]   ;;  %s4080_s4 = inlined_call_operand.vmem [shape: bf16[2,96,64], index: 4, kind: input, shape index: {}]   ;;  %s4081_s5 = inlined_call_operand.vmem [shape: f32[2,3,512], index: 5, kind: output, shape index: {}]  }
   0x1   :  { %s2764_s20 = smov 0  }
   0x2 LB: > { %s27_s21 = sadd.s32 1, %s2715_s19  ;;  %p2466_p0 = scmp.ge.s32.totalorder %s2719_s20, 1  ;;  %s2719_s20 = sphi %s2764_s20, %s15_s20   ;;  %s2715_s19 = sphi %s2762_s19, %s4101_s19   ;;  %s2711_s18 = sphi %s2760_s18, %s4100_s18  }
   0x3   : > { %p29_p1 = scmp.ge.s32.totalorder %s27_s21, 2  ;;  %p212_p2 = scmp.lt.s32.totalorder %s2719_s20, 3 }
   0x5   : > { %s4103_s21 = smov (%p29_p1, %s27_s21), 0  ;;  %p213_p3 = pnand %p2466_p0, %p212_p2 }
   0x6   : > { %p255_p4 = scmp.lt.s32.totalorder (!%p213_p3), %s2711_s18, 1 }
   0x7   : > { %216 = sbr.rel (%p213_p3) target bundleno = 762 (0x2fa), region = 40 }
   0xc   : > { %v275_v0 = vld [vmem:[%s4077_s1] sm:$0xff]  ;;  %v2721_v1 = vmov 0   ;;  %v2722_v2 = vmov 1   ;;  %v2792_v4 = vld [vmem:[%s4076_s0 + $0x8] sm:$0x77]  ;;  %s4105_s18 = smov (!%p255_p4, %s2711_s18), 1 }
   0xd   : > { %2691 = vset.pattern.permute.xlu0 %v2721_v1  ;;  %v2787_v3 = vld [vmem:[%s4076_s0] sm:$0x77]  ;;  %v285_v8 = vperm.slane %v2792_v4, 0  ;;  %v2723_v46 = vmov 683565275   ;;  %s2647_s6 = smul.u32 48, %s4105_s18 }
   0xe   : > { %278 = vperm.xlu0 %2691, %v275_v0   ;;  %v283_v6 = vperm.slane %v2787_v3, 0  ;;  %v284_v7 = vperm.slane %v2787_v3, 4  ;;  %v2724_v48 = vmov 2475754826   ;;  %v2725_v52 = vmov 2131351028  }
   0xf   : > { %v293_v11 = vperm.slane %v285_v8, 0  ;;  %v2726_v55 = vmov 2102212464   ;;  %v2727_v58 = vmov 920167782   ;;  %s3909_s9 = scalar_lea.vmem %s4080_s4, %s2647_s6  ;;  %s2640_s10 = sshll.u32 %s4105_s18, 4 }
  0x10   : > { %v291_v9 = vperm.slane %v283_v6, 0  ;;  %v292_v10 = vperm.slane %v284_v7, 0  ;;  %v2728_v61 = vmov 1326507024   ;;  %s268_s18 = scalar_lea.vmem %s4081_s5, %s2640_s10 }
  0x16   : > { %2692 = vset.pattern.permute.xlu0 %v2722_v2 }
  0x17   : > { %300 = vperm.xlu0 %2692, %v275_v0  }
  0x80   : > { %v2794_v5 = vpop.permute.xlu0 %278 }
  0x81   : > { %v295_v12 = vmul.f32 %v291_v9, %v2794_v5  ;;  %v296_v13 = vmul.f32 %v292_v10, %v2794_v5  ;;  %v297_v15 = vmul.f32 %v293_v11, %v2794_v5 }
  0x89   : > { %v2801_v14 = vpop.permute.xlu0 %300 }
  0x8a   : > { %v2805_v16 = vsub.f32 %v295_v12, %v2801_v14  ;;  %v2808_v17 = vsub.f32 %v296_v13, %v2801_v14  ;;  %v2811_v18 = vsub.f32 %v297_v15, %v2801_v14 }
  0x8c   : > { %v307_v19 = vand.u32 2147483647, %v2805_v16  ;;  %v310_v20 = vand.u32 2139095040, %v2805_v16  ;;  %v461_v21 = vand.u32 2147483647, %v2808_v17  ;;  %v464_v22 = vand.u32 2139095040, %v2808_v17 }
  0x8d   : > { %v618_v27 = vand.u32 2139095040, %v2811_v18 }
  0x8e   : > { %v311_v23 = vshrl.u32 %v310_v20, 23  ;;  %v314_v24 = vand.u32 8388607, %v307_v19  ;;  %v465_v25 = vshrl.u32 %v464_v22, 23  ;;  %v468_v26 = vand.u32 8388607, %v461_v21 }
  0x8f   : > { %v619_v34 = vshrl.u32 %v618_v27, 23 }
  0x90   : > { %v2470_v28 = vadd.s32 4294967169, %v311_v23  ;;  %v315_v29 = vor.u32 8388608, %v314_v24  ;;  %v2473_v30 = vadd.s32 4294967169, %v465_v25  ;;  %v469_v31 = vor.u32 8388608, %v468_v26 }
  0x91   : > { %v2826_v40 = vadd.s32 4294967169, %v619_v34 }
  0x92   : > { %v317_v32 = vadd.s32 1, %v2470_v28  ;;  %v471_v33 = vadd.s32 1, %v2473_v30  ;;  %v2822_v35 = vshll.u32 %v315_v29, 8  ;;  %v2824_v37 = vshll.u32 %v469_v31, 8 }
  0x94   : > { %vm318_vm0 = vcmp.gt.s32.totalorder %v317_v32, 0  ;;  %vm472_vm1 = vcmp.gt.s32.totalorder %v471_v33, 0  ;;  %v2829_v42 = vand.u32 65535, %v2822_v35  ;;  %v2832_v43 = vshrl.u32 %v2822_v35, 16 }
  0x95   : > { %v319_v36 = vsel %vm318_vm0, %v317_v32, 0  ;;  %v473_v39 = vsel %vm472_vm1, %v471_v33, 0  ;;  %v2841_v50 = vand.u32 65535, %v2824_v37 }
  0x96   : > { %v321_v38 = vand.u32 31, %v319_v36  ;;  %v2834_v44 = vand.u32 31, %v473_v39  ;;  %v2836_v45 = vshrl.u32 %v319_v36, 5  ;;  %v2883_v36 = vshrl.u32 %v473_v39, 5 }
  0x98   : > { %v322_v41 = vsub.s32 32, %v321_v38  ;;  %v324_v47 = vshll.u32 %v2723_v46, %v321_v38  ;;  %v327_v49 = vshll.u32 %v2724_v48, %v321_v38  ;;  %v330_v54 = vshll.u32 %v2725_v52, %v321_v38 }
  0x99   : > { %v333_v57 = vshll.u32 %v2726_v55, %v321_v38  ;;  %v336_v60 = vshll.u32 %v2727_v58, %v321_v38  ;;  %v2852_v6 = vsub.s32 32, %v2834_v44  ;;  %vm339_vm2 = vcmp.lt.s32.totalorder %v2836_v45, 1 }
  0x9a   : > { %v325_v51 = vshrl.u32 %v2724_v48, %v322_v41  ;;  %v328_v53 = vshrl.u32 %v2725_v52, %v322_v41  ;;  %v331_v56 = vshrl.u32 %v2726_v55, %v322_v41  ;;  %v334_v59 = vshrl.u32 %v2727_v58, %v322_v41 }
  0x9b   : > { %v337_v62 = vshrl.u32 %v2728_v61, %v322_v41  ;;  %vm340_vm3 = vcmp.lt.s32.totalorder %v2836_v45, 2  ;;  %v323_v9 = vshrl.u32 %v2723_v46, %v322_v41  ;;  %vm342_vm4 = vcmp.lt.s32.totalorder %v2836_v45, 4 }
  0x9c   : > { %v326_v63 = vor.u32 %v325_v51, %v324_v47  ;;  %v329_v0 = vor.u32 %v328_v53, %v327_v49  ;;  %v332_v2 = vor.u32 %v331_v56, %v330_v54  ;;  %v335_v7 = vor.u32 %v334_v59, %v333_v57 }
  0x9d   : > { %v338_v8 = vor.u32 %v337_v62, %v336_v60  ;;  %vm341_vm5 = vcmp.lt.s32.totalorder %v2836_v45, 3  ;;  %v478_v15 = vshll.u32 %v2723_v46, %v2834_v44  ;;  %v479_v24 = vshrl.u32 %v2724_v48, %v2852_v6 }
  0x9e   : > { %v347_v10 = vsel %vm339_vm2, %v326_v63, %v329_v0  ;;  %v351_v11 = vsel %vm339_vm2, %v329_v0, %v332_v2  ;;  %v348_v12 = vsel %vm342_vm4, %v335_v7, 920167782  ;;  %v344_v20 = vsel %vm342_vm4, %v332_v2, 2102212464 }
  0x9f   : > { %v352_v13 = vsel %vm342_vm4, %v338_v8, 1326507024  ;;  %v349_v22 = vsel %vm341_vm5, %v332_v2, %v348_v12  ;;  %v481_v27 = vshll.u32 %v2724_v48, %v2834_v44  ;;  %v482_v28 = vshrl.u32 %v2725_v52, %v2852_v6 }
  0xa0   : > { %v353_v23 = vsel %vm341_vm5, %v335_v7, %v352_v13  ;;  %v350_v25 = vsel %vm340_vm3, %v347_v10, %v349_v22  ;;  %v343_v33 = vsel %vm339_vm2, %v323_v9, %v326_v63  ;;  %v345_v34 = vsel %vm341_vm5, %v329_v0, %v344_v20 }
  0xa1   : > { %v354_v26 = vsel %vm340_vm3, %v351_v11, %v353_v23  ;;  %v380_v31 = vand.u32 65535, %v350_v25  ;;  %v381_v32 = vshrl.u32 %v350_v25, 16  ;;  %v2885_v38 = vor.u32 %v479_v24, %v478_v15 }
  0xa2   : > { %v358_v29 = vand.u32 65535, %v354_v26  ;;  %v359_v30 = vshrl.u32 %v354_v26, 16  ;;  %v2889_v49 = vor.u32 %v482_v28, %v481_v27  ;;  %v485_v51 = vshrl.u32 %v2726_v55, %v2852_v6 }
  0xa3   : > { %v383_v54 = vmul.u32 %v381_v32, %v2829_v42  ;;  %v384_v56 = vmul.u32 %v380_v31, %v2832_v43  ;;  %v484_v39 = vshll.u32 %v2725_v52, %v2834_v44  ;;  %v382_v60 = vmul.u32 %v380_v31, %v2829_v42 }
  0xa4   : > { %v361_v41 = vmul.u32 %v359_v30, %v2829_v42  ;;  %v362_v47 = vmul.u32 %v358_v29, %v2832_v43  ;;  %v360_v53 = vmul.u32 %v358_v29, %v2829_v42  ;;  %v363_v57 = vmul.u32 %v359_v30, %v2832_v43 }
  0xa5   : > { %v385_v62 = vmul.u32 %v381_v32, %v2832_v43  ;;  %v386_v7 = vshll.u32 %v383_v54, 16  ;;  %v388_v9 = vshll.u32 %v384_v56, 16  ;;  %v2901_v10 = vor.u32 %v485_v51, %v484_v39 }
  0xa6   : > { %v364_v59 = vshll.u32 %v361_v41, 16  ;;  %v365_v63 = vshrl.u32 %v361_v41, 16  ;;  %v366_v0 = vshll.u32 %v362_v47, 16  ;;  %v367_v2 = vshrl.u32 %v362_v47, 16 }
  0xa7   : > { %vm390_vm7 = vc.u32 %v382_v60, %v386_v7  ;;  %v392_v12 = vadd.s32 %v386_v7, %v382_v60  ;;  %v488_v13 = vshrl.u32 %v2727_v58, %v2852_v6  ;;  %v487_v43 = vshll.u32 %v2726_v55, %v2834_v44 }
  0xa8   : > { %vm368_vm6 = vc.u32 %v360_v53, %v364_v59  ;;  %v370_v8 = vadd.s32 %v364_v59, %v360_v53  ;;  %v391_v42 = vsel %vm390_vm7, 1, %v2721_v1  ;;  %v490_v23 = vshll.u32 %v2727_v58, %v2834_v44 }
  0xa9   : > { %v369_v11 = vsel %vm368_vm6, 1, %v2721_v1  ;;  %v393_v22 = vadd.s32 %v391_v42, %v385_v62  ;;  %vm394_vm9 = vc.u32 %v392_v12, %v388_v9  ;;  %v489_v26 = vor.u32 %v488_v13, %v487_v43 }
  0xaa   : > { %v371_v15 = vadd.s32 %v369_v11, %v363_v57  ;;  %vm372_vm8 = vc.u32 %v370_v8, %v366_v0  ;;  %v395_v25 = vsel %vm394_vm9, 1, %v2721_v1  ;;  %v491_v27 = vshrl.u32 %v2728_v61, %v2852_v6 }
  0xab   : > { %v373_v20 = vsel %vm372_vm8, 1, %v2721_v1  ;;  %v387_v28 = vshrl.u32 %v383_v54, 16  ;;  %v389_v29 = vshrl.u32 %v384_v56, 16  ;;  %v2915_v30 = vadd.s32 %v392_v12, %v388_v9 }
  0xac   : > { %v375_v24 = vadd.s32 %v373_v20, %v371_v15  ;;  %v397_v31 = vadd.s32 %v395_v25, %v393_v22  ;;  %v492_v41 = vor.u32 %v491_v27, %v490_v23  ;;  %vm493_vm10 = vcmp.lt.s32.totalorder %v2883_v36, 1 }
  0xad   : > { %vm496_vm11 = vcmp.lt.s32.totalorder %v2883_v36, 4  ;;  %vm495_vm12 = vcmp.lt.s32.totalorder %v2883_v36, 3  ;;  %v501_v44 = vsel %vm493_vm10, %v2885_v38, %v2889_v49  ;;  %vm494_vm13 = vcmp.lt.s32.totalorder %v2883_v36, 2 }
  0xae   : > { %v376_v32 = vadd.s32 %v375_v24, %v365_v63  ;;  %v398_v47 = vadd.s32 %v397_v31, %v387_v28  ;;  %v502_v51 = vsel %vm496_vm11, %v489_v26, 920167782  ;;  %v505_v56 = vsel %vm493_vm10, %v2889_v49, %v2901_v10 }
  0xaf   : > { %v503_v54 = vsel %vm495_vm12, %v2901_v10, %v502_v51  ;;  %v346_v39 = vsel %vm340_vm3, %v343_v33, %v345_v34  ;;  %v506_v60 = vsel %vm496_vm11, %v492_v41, 1326507024  ;;  %v511_v63 = vshrl.u32 %v2824_v37, 16 }
  0xb0   : > { %v2926_v53 = vadd.s32 %v376_v32, %v367_v2  ;;  %v399_v57 = vadd.s32 %v398_v47, %v389_v29  ;;  %v504_v59 = vsel %vm494_vm13, %v501_v44, %v503_v54  ;;  %v507_v62 = vsel %vm495_vm12, %v489_v26, %v506_v60 }
  0xb1   : > { %v534_v0 = vand.u32 65535, %v504_v59  ;;  %v508_v45 = vsel %vm494_vm13, %v505_v56, %v507_v62  ;;  %v535_v33 = vshrl.u32 %v504_v59, 16  ;;  %v625_v34 = vadd.s32 1, %v2826_v40 }
  0xb2   : > { %vm402_vm14 = vc.u32 %v2926_v53, %v2915_v30  ;;  %v403_v2 = vadd.s32 1, %v399_v57  ;;  %v400_v7 = vmul.u32 %v2822_v35, %v346_v39  ;;  %v512_v8 = vand.u32 65535, %v508_v45 }
  0xb3   : > { %v513_v9 = vshrl.u32 %v508_v45, 16  ;;  %v537_v12 = vmul.u32 %v535_v33, %v2841_v50  ;;  %v538_v13 = vmul.u32 %v534_v0, %v511_v63  ;;  %v536_v20 = vmul.u32 %v534_v0, %v2841_v50 }
  0xb4   : > { %v404_v11 = vsel %vm402_vm14, %v403_v2, %v399_v57  ;;  %v516_v43 = vmul.u32 %v512_v8, %v511_v63  ;;  %v539_v22 = vmul.u32 %v535_v33, %v511_v63  ;;  %vm626_vm15 = vcmp.gt.s32.totalorder %v625_v34, 0 }
  0xb5   : > { %v405_v15 = vadd.s32 %v404_v11, %v400_v7  ;;  %v515_v42 = vmul.u32 %v513_v9, %v2841_v50  ;;  %v540_v23 = vshll.u32 %v537_v12, 16  ;;  %v514_v40 = vmul.u32 %v512_v8, %v2841_v50 }
  0xb6   : > { %v517_v25 = vmul.u32 %v513_v9, %v511_v63  ;;  %v520_v26 = vshll.u32 %v516_v43, 16  ;;  %v542_v27 = vshll.u32 %v538_v13, 16  ;;  %v615_v44 = vand.u32 2147483647, %v2811_v18 }
  0xb7   : > { %v406_v24 = vadd.s32 536870912, %v405_v15  ;;  %v518_v35 = vshll.u32 %v515_v42, 16  ;;  %vm544_vm0 = vc.u32 %v536_v20, %v540_v23  ;;  %v546_v28 = vadd.s32 %v540_v23, %v536_v20 }
  0xb8   : > { %v545_v32 = vsel %vm544_vm0, 1, %v2721_v1  ;;  %v498_v51 = vsel %vm496_vm11, %v2901_v10, 2102212464  ;;  %v477_v56 = vshrl.u32 %v2723_v46, %v2852_v6  ;;  %v627_v59 = vsel %vm626_vm15, %v625_v34, 0 }
  0xb9   : > { %v2955_v29 = vshrl.u32 %v406_v24, 30  ;;  %vm522_vm1 = vc.u32 %v514_v40, %v518_v35  ;;  %v524_v31 = vadd.s32 %v518_v35, %v514_v40  ;;  %v547_v47 = vadd.s32 %v545_v32, %v539_v22 }
  0xba   : > { %v523_v41 = vsel %vm522_vm1, 1, %v2721_v1  ;;  %vm548_vm2 = vc.u32 %v546_v28, %v542_v27  ;;  %v519_v62 = vshrl.u32 %v515_v42, 16  ;;  %v497_v2 = vsel %vm493_vm10, %v477_v56, %v2885_v38 }
  0xbb   : > { %v408_v50 = vshll.u32 %v2955_v29, 30  ;;  %v525_v54 = vadd.s32 %v523_v41, %v517_v25  ;;  %vm526_vm3 = vc.u32 %v524_v31, %v520_v26  ;;  %v549_v57 = vsel %vm548_vm2, 1, %v2721_v1 }
  0xbc   : > { %v527_v39 = vsel %vm526_vm3, 1, %v2721_v1  ;;  %v551_v0 = vadd.s32 %v549_v57, %v547_v47  ;;  %v499_v10 = vsel %vm495_vm12, %v2889_v49, %v498_v51  ;;  %v541_v45 = vshrl.u32 %v537_v12, 16 }
  0xbd   : > { %v409_v60 = vsub.s32 %v405_v15, %v408_v50  ;;  %v529_v63 = vadd.s32 %v527_v39, %v525_v54  ;;  %v629_v6 = vand.u32 31, %v627_v59  ;;  %v622_v34 = vand.u32 8388607, %v615_v44 }
  0xbe   : > { %v521_v8 = vshrl.u32 %v516_v43, 16  ;;  %v543_v9 = vshrl.u32 %v538_v13, 16  ;;  %v552_v11 = vadd.s32 %v551_v0, %v541_v45  ;;  %v401_v38 = vadd.s32 %v2915_v30, %v2926_v53 }
  0xbf   : > { %vm410_vm4 = vcmp.lt.s32.totalorder %v409_v60, 0  ;;  %v411_v33 = vsub.s32 0, %v409_v60  ;;  %v530_v7 = vadd.s32 %v529_v63, %v519_v62  ;;  %v2977_v15 = vsub.s32 32, %v629_v6 }
  0xc0   : > { %v500_v49 = vsel %vm494_vm13, %v497_v2, %v499_v10  ;;  %v2983_v12 = vadd.s32 %v546_v28, %v542_v27  ;;  %v553_v23 = vadd.s32 %v552_v11, %v543_v9  ;;  %v632_v24 = vshll.u32 %v2723_v46, %v629_v6 }
  0xc1   : > { %v412_v42 = vsel %vm410_vm4, %v411_v33, %v409_v60  ;;  %v2985_v22 = vadd.s32 %v530_v7, %v521_v8  ;;  %v633_v13 = vshrl.u32 %v2724_v48, %v2977_v15  ;;  %v635_v43 = vshll.u32 %v2724_v48, %v629_v6 }
  0xc2   : > { %v413_v20 = vclz %v412_v42  ;;  %v636_v30 = vshrl.u32 %v2725_v52, %v2977_v15  ;;  %v639_v36 = vshrl.u32 %v2726_v55, %v2977_v15  ;;  %vm309_vm5 = vcmp.lt.s32.totalorder %v2805_v16, 0 }
  0xc3   : > { %v554_v40 = vmul.u32 %v2824_v37, %v500_v49  ;;  %vm556_vm6 = vc.u32 %v2985_v22, %v2983_v12  ;;  %v557_v25 = vadd.s32 1, %v553_v23  ;;  %v2999_v35 = vshrl.u32 %v627_v59, 5 }
  0xc4   : > { %v2471_v53 = vadd.s32 4294967294, %v413_v20  ;;  %v3001_v26 = vor.u32 %v633_v13, %v632_v24  ;;  %v3003_v27 = vor.u32 %v636_v30, %v635_v43  ;;  %v638_v28 = vshll.u32 %v2725_v52, %v629_v6 }
  0xc5   : > { %v558_v31 = vsel %vm556_vm6, %v557_v25, %v553_v23  ;;  %v641_v32 = vshll.u32 %v2726_v55, %v629_v6  ;;  %v642_v41 = vshrl.u32 %v2727_v58, %v2977_v15  ;;  %v645_v51 = vshrl.u32 %v2728_v61, %v2977_v15 }
  0xc6   : > { %vm2472_vm7 = vcmp.lt.s32.totalorder %v2471_v53, 0  ;;  %v559_v47 = vadd.s32 %v558_v31, %v554_v40  ;;  %v640_v50 = vor.u32 %v639_v36, %v638_v28  ;;  %v644_v57 = vshll.u32 %v2727_v58, %v629_v6 }
  0xc7   : > { %v416_v37 = vsel %vm2472_vm7, 0, %v2471_v53  ;;  %v643_v39 = vor.u32 %v642_v41, %v641_v32  ;;  %v431_v62 = vsub.s32 4, %v2955_v29  ;;  %v623_v0 = vor.u32 8388608, %v622_v34 }
  0xc8   : > { %v417_v54 = vsub.s32 32, %v416_v37  ;;  %v421_v56 = vsub.s32 4294967266, %v416_v37  ;;  %v418_v59 = vshll.u32 %v409_v60, %v416_v37  ;;  %v560_v63 = vadd.s32 536870912, %v559_v47 }
  0xc9   : > { %v646_v45 = vor.u32 %v645_v51, %v644_v57  ;;  %vm650_vm8 = vcmp.lt.s32.totalorder %v2999_v35, 4  ;;  %vm647_vm9 = vcmp.lt.s32.totalorder %v2999_v35, 1  ;;  %vm649_vm10 = vcmp.lt.s32.totalorder %v2999_v35, 3 }
  0xca   : > { %v419_v2 = vshrl.u32 %v401_v38, %v417_v54  ;;  %v422_v10 = vadd.s32 127, %v421_v56  ;;  %v3014_v33 = vshrl.u32 %v560_v63, 30  ;;  %v656_v7 = vsel %vm650_vm8, %v643_v39, 920167782 }
  0xcb   : > { %v655_v34 = vsel %vm647_vm9, %v3001_v26, %v3003_v27  ;;  %v657_v8 = vsel %vm649_vm10, %v640_v50, %v656_v7  ;;  %v432_v9 = vsel %vm309_vm5, %v431_v62, %v2955_v29  ;;  %v3030_v38 = vshll.u32 %v623_v0, 8 }
  0xcc   : > { %v420_v6 = vor.u32 %v419_v2, %v418_v59  ;;  %v423_v60 = vshll.u32 %v422_v10, 23  ;;  %v562_v11 = vshll.u32 %v3014_v33, 30  ;;  %vm648_vm11 = vcmp.lt.s32.totalorder %v2999_v35, 2 }
  0xcd   : > { %v659_v49 = vsel %vm647_vm9, %v3003_v27, %v640_v50  ;;  %v660_v20 = vsel %vm650_vm8, %v646_v45, 1326507024  ;;  %v658_v24 = vsel %vm648_vm11, %v655_v34, %v657_v8  ;;  %vm3044_vm12 = vcmp.le.f32.partialorder %v307_v19, 0.7853982 }
  0xce   : > { %v424_v42 = vor.u32 4788187, %v423_v60  ;;  %v563_v23 = vsub.s32 %v559_v47, %v562_v11  ;;  %v661_v29 = vsel %vm649_vm10, %v643_v39, %v660_v20  ;;  %v427_v30 = vcvt.s32.f32 %v420_v6 }
  0xcf   : > { %v662_v36 = vsel %vm648_vm11, %v659_v49, %v661_v29  ;;  %v434_v53 = vsel %vm3044_vm12, 0, %v432_v9  ;;  %v664_v31 = vand.u32 65535, %v3030_v38  ;;  %v689_v41 = vshrl.u32 %v658_v24, 16 }
  0xd0   : > { %v425_v43 = vand.u32 2147483647, %v424_v42  ;;  %vm564_vm13 = vcmp.lt.s32.totalorder %v563_v23, 0  ;;  %v565_v40 = vsub.s32 0, %v563_v23  ;;  %v666_v25 = vand.u32 65535, %v662_v36 }
  0xd1   : > { %v667_v32 = vshrl.u32 %v662_v36, 16  ;;  %v665_v37 = vshrl.u32 %v3030_v38, 16  ;;  %v3054_v51 = vand.u32 3, %v434_v53  ;;  %v631_v39 = vshrl.u32 %v2723_v46, %v2977_v15 }
  0xd2   : > { %v428_v28 = vmul.f32 %v427_v30, %v425_v43  ;;  %v566_v19 = vsel %vm564_vm13, %v565_v40, %v563_v23  ;;  %v688_v59 = vand.u32 65535, %v658_v24  ;;  %v3060_v62 = vmul.u32 %v689_v41, %v664_v31 }
  0xd3   : > { %v567_v54 = vclz %v566_v19  ;;  %v669_v56 = vmul.u32 %v667_v32, %v664_v31  ;;  %v3058_v57 = vmul.u32 %v666_v25, %v665_v37  ;;  %v668_v2 = vmul.u32 %v666_v25, %v664_v31 }
  0xd4   : > { %v429_v47 = vxor.u32 2147483648, %v428_v28  ;;  %v555_v7 = vadd.s32 %v2983_v12, %v2985_v22  ;;  %v652_v15 = vsel %vm650_vm8, %v640_v50, 2102212464  ;;  %v671_v6 = vmul.u32 %v667_v32, %v665_v37 }
  0xd5   : > { %v2474_v0 = vadd.s32 4294967294, %v567_v54  ;;  %v672_v10 = vshll.u32 %v669_v56, 16  ;;  %v674_v9 = vshll.u32 %v3058_v57, 16  ;;  %v694_v42 = vshll.u32 %v3060_v62, 16 }
  0xd6   : > { %v430_v63 = vsel %vm309_vm5, %v429_v47, %v428_v28  ;;  %v690_v22 = vmul.u32 %v688_v59, %v664_v31  ;;  %v692_v29 = vmul.u32 %v688_v59, %v665_v37  ;;  %v693_v19 = vmul.u32 %v689_v41, %v665_v37 }
  0xd7   : > { %v3067_v45 = vsel %vm3044_vm12, %v2805_v16, %v430_v63  ;;  %vm2475_vm14 = vcmp.lt.s32.totalorder %v2474_v0, 0  ;;  %vm676_vm15 = vc.u32 %v668_v2, %v672_v10  ;;  %v678_v34 = vadd.s32 %v672_v10, %v668_v2 }
  0xd8   : > { %v435_v60 = vmul.f32 %v3067_v45, %v3067_v45  ;;  %v570_v8 = vsel %vm2475_vm14, 0, %v2474_v0  ;;  %v677_v11 = vsel %vm676_vm15, 1, %v2721_v1  ;;  %vm698_vm1 = vc.u32 %v690_v22, %v694_v42 }
  0xd9   : > { %v571_v12 = vsub.s32 32, %v570_v8  ;;  %v575_v24 = vsub.s32 4294967266, %v570_v8  ;;  %v679_v50 = vadd.s32 %v677_v11, %v671_v6  ;;  %vm680_vm0 = vc.u32 %v678_v34, %v674_v9 }
  0xda   : > { %v436_v49 = vmul.f32 -0.001358992, %v435_v60  ;;  %v443_v20 = vmul.f32 -0.00019511016, %v435_v60  ;;  %v681_v36 = vsel %vm680_vm0, 1, %v2721_v1  ;;  %v572_v53 = vshll.u32 %v563_v23, %v570_v8 }
  0xdb   : > { %v573_v30 = vshrl.u32 %v555_v7, %v571_v12  ;;  %v576_v40 = vadd.s32 127, %v575_v24  ;;  %v683_v25 = vadd.s32 %v681_v36, %v679_v50  ;;  %v699_v47 = vsel %vm698_vm1, 1, %v2721_v1 }
  0xdc   : > { %v437_v13 = vadd.f32 0.041655596, %v436_v49  ;;  %v444_v43 = vadd.f32 0.008332121, %v443_v20  ;;  %v673_v63 = vshrl.u32 %v669_v56, 16  ;;  %v700_v0 = vadd.s32 %v694_v42, %v690_v22 }
  0xdd   : > { %v574_v54 = vor.u32 %v573_v30, %v572_v53  ;;  %v577_v31 = vshll.u32 %v576_v40, 23  ;;  %vm463_vm2 = vcmp.lt.s32.totalorder %v2808_v17, 0  ;;  %v696_v10 = vshll.u32 %v692_v29, 16 }
  0xde   : > { %v438_v28 = vmul.f32 %v437_v13, %v435_v60  ;;  %v445_v32 = vmul.f32 %v444_v43, %v435_v60  ;;  %v701_v7 = vadd.s32 %v699_v47, %v693_v19  ;;  %vm453_vm3 = vcmp.eq.s32.totalorder %v3054_v51, 0 }
  0xdf   : > { %vm456_vm4 = vcmp.eq.s32.totalorder %v3054_v51, 2  ;;  %vm3085_vm5 = vcmp.le.f32.partialorder %v461_v21, 0.7853982  ;;  %v578_v41 = vor.u32 4788187, %v577_v31  ;;  %v651_v37 = vsel %vm647_vm9, %v631_v39, %v3001_v26 }
  0xe0   : > { %v439_v2 = vadd.f32 -0.4999988, %v438_v28  ;;  %v446_v59 = vadd.f32 -0.16666654, %v445_v32  ;;  %v684_v56 = vadd.s32 %v683_v25, %v673_v63  ;;  %vm452_vm6 = vcmp.lt.s32.totalorder %v3054_v51, 2 }
  0xe1   : > { %v653_v8 = vsel %vm649_vm10, %v3003_v27, %v652_v15  ;;  %vm702_vm7 = vc.u32 %v700_v0, %v696_v10  ;;  %vm450_vm8 = vweird.f32 %v2805_v16  ;;  %v579_v21 = vand.u32 2147483647, %v578_v41 }
  0xe2   : > { %v440_v6 = vmul.f32 %v439_v2, %v435_v60  ;;  %v447_v34 = vmul.f32 %v446_v59, %v435_v60  ;;  %v581_v9 = vcvt.s32.f32 %v574_v54  ;;  %v675_v11 = vshrl.u32 %v3058_v57, 16 }
  0xe3   : > { %v703_v42 = vsel %vm702_vm7, 1, %v2721_v1  ;;  %v695_v39 = vshrl.u32 %v3060_v62, 16  ;;  %v286_v22 = vperm.slane %v2792_v4, 4  ;;  %v923_v27 = vperm.slane %v2787_v3, 1 }
  0xe4   : > { %v441_v49 = vadd.f32 1.0, %v440_v6  ;;  %v448_v26 = vadd.f32 1.0, %v447_v34  ;;  %v705_v60 = vadd.s32 %v703_v42, %v701_v7  ;;  %v582_v20 = vmul.f32 %v581_v9, %v579_v21 }
  0xe5   : > { %v3100_v12 = vadd.s32 %v684_v56, %v675_v11  ;;  %v697_v50 = vshrl.u32 %v692_v29, 16  ;;  %v3105_v43 = vadd.s32 %v700_v0, %v696_v10  ;;  %v294_v30 = vperm.slane %v286_v22, 0 }
  0xe6   : > { %v449_v15 = vmul.f32 %v448_v26, %v3067_v45  ;;  %v457_v24 = vxor.u32 2147483648, %v441_v49  ;;  %v706_v13 = vadd.s32 %v705_v60, %v695_v39  ;;  %v583_v57 = vxor.u32 2147483648, %v582_v20 }
  0xe7   : > { %v931_v36 = vperm.slane %v923_v27, 1  ;;  %v585_v62 = vsub.s32 4, %v3014_v33  ;;  %v654_v40 = vsel %vm648_vm11, %v651_v37, %v653_v8  ;;  %vm710_vm9 = vc.u32 %v3100_v12, %v3105_v43 }
  0xe8   : > { %v454_v53 = vxor.u32 2147483648, %v449_v15  ;;  %v707_v25 = vadd.s32 %v706_v13, %v697_v50  ;;  %v458_v3 = vsel %vm456_vm4, %v457_v24, %v449_v15  ;;  %v584_v4 = vsel %vm463_vm2, %v583_v57, %v582_v20 }
  0xe9   : > { %v298_v45 = vmul.f32 %v294_v30, %v2794_v5  ;;  %v587_v35 = vsel %vm3085_vm5, %v2808_v17, %v584_v4  ;;  %v935_v32 = vmul.f32 %v931_v36, %v2794_v5  ;;  %v708_v54 = vmul.u32 %v3030_v38, %v654_v40 }
  0xea   : > { %v455_v29 = vsel %vm453_vm3, %v441_v49, %v454_v53  ;;  %v711_v28 = vadd.s32 1, %v707_v25  ;;  %v589_v47 = vmul.f32 %v587_v35, %v587_v35  ;;  %v586_v0 = vsel %vm463_vm2, %v585_v62, %v3014_v33 }
  0xeb   : > { %v459_v19 = vsel %vm452_vm6, %v455_v29, %v458_v3  ;;  %v3127_v31 = vsub.f32 %v298_v45, %v2801_v14  ;;  %v3135_v59 = vsub.f32 %v935_v32, %v2801_v14  ;;  %v588_v16 = vsel %vm3085_vm5, 0, %v586_v0 }
  0xec   : > { %v460_v63 = vsel %vm450_vm8, nan, %v459_v19  ;;  %v712_v2 = vsel %vm710_vm9, %v711_v28, %v707_v25  ;;  %v590_v51 = vmul.f32 -0.001358992, %v589_v47  ;;  %v597_v10 = vmul.f32 -0.00019511016, %v589_v47 }
  0xed   : > { %1591 = vmatpush.msra.mxu0 %v460_v63  ;;  %v713_v7 = vadd.s32 %v712_v2, %v708_v54  ;;  %v769_v38 = vand.u32 2147483647, %v3127_v31  ;;  %v772_v41 = vand.u32 2139095040, %v3127_v31  ;;  %v946_v33 = vand.u32 2139095040, %v3135_v59 }
  0xee   : > { %v591_v37 = vadd.f32 0.041655596, %v590_v51  ;;  %v598_v56 = vadd.f32 0.008332121, %v597_v10  ;;  %v605_v11 = vand.u32 3, %v588_v16  ;;  %vm617_vm10 = vcmp.lt.s32.totalorder %v2811_v18, 0 }
  0xef   : > { %v714_v6 = vadd.s32 536870912, %v713_v7  ;;  %v773_v34 = vshrl.u32 %v772_v41, 23  ;;  %v776_v49 = vand.u32 8388607, %v769_v38  ;;  %v943_v26 = vand.u32 2147483647, %v3135_v59 }
  0xf0   : > { %v592_v8 = vmul.f32 %v591_v37, %v589_v47  ;;  %v599_v21 = vmul.f32 %v598_v56, %v589_v47  ;;  %v947_v27 = vshrl.u32 %v946_v33, 23  ;;  %vm3148_vm11 = vcmp.le.f32.partialorder %v615_v44, 0.7853982 }
  0xf1   : > { %v715_v9 = vshrl.u32 %v714_v6, 30  ;;  %v2479_v42 = vadd.s32 4294967169, %v773_v34  ;;  %vm604_vm12 = vweird.f32 %v2808_v17  ;;  %vm606_vm13 = vcmp.lt.s32.totalorder %v605_v11, 2 }
  0xf2   : > { %v593_v39 = vadd.f32 -0.4999988, %v592_v8  ;;  %v600_v60 = vadd.f32 -0.16666654, %v599_v21  ;;  %v777_v57 = vor.u32 8388608, %v776_v49  ;;  %vm607_vm0 = vcmp.eq.s32.totalorder %v605_v11, 0 }
  0xf3   : > { %v716_v23 = vshll.u32 %v715_v9, 30  ;;  %v739_v20 = vsub.s32 4, %v715_v9  ;;  %v779_v22 = vadd.s32 1, %v2479_v42  ;;  %v3155_v30 = vand.u32 8388607, %v943_v26 }
  0xf4   : > { %v594_v15 = vmul.f32 %v593_v39, %v589_v47  ;;  %v601_v24 = vmul.f32 %v600_v60, %v589_v47  ;;  %v2482_v25 = vadd.s32 4294967169, %v947_v27  ;;  %vm610_vm1 = vcmp.eq.s32.totalorder %v605_v11, 2 }
  0xf5   : > { %v717_v13 = vsub.s32 %v713_v7, %v716_v23  ;;  %vm780_vm14 = vcmp.gt.s32.totalorder %v779_v22, 0  ;;  %v3159_v44 = vsel %vm617_vm10, %v739_v20, %v715_v9  ;;  %v709_v28 = vadd.s32 %v3105_v43, %v3100_v12 }
  0xf6   : > { %v595_v36 = vadd.f32 1.0, %v594_v15  ;;  %v602_v53 = vadd.f32 1.0, %v601_v24  ;;  %v781_v40 = vsel %vm780_vm14, %v779_v22, 0  ;;  %v3165_v19 = vshll.u32 %v777_v57, 8 }
  0xf7   : > { %vm718_vm15 = vcmp.lt.s32.totalorder %v717_v13, 0  ;;  %v719_v62 = vsub.s32 0, %v717_v13  ;;  %v3161_v29 = vshrl.u32 %v781_v40, 5  ;;  %v742_v54 = vsel %vm3148_vm11, 0, %v3159_v44 }
  0xf8   : > { %v603_v3 = vmul.f32 %v602_v53, %v587_v35  ;;  %v611_v4 = vxor.u32 2147483648, %v595_v36  ;;  %v783_v63 = vand.u32 31, %v781_v40  ;;  %v951_v0 = vor.u32 8388608, %v3155_v30 }
  0xf9   : > { %v720_v45 = vsel %vm718_vm15, %v719_v62, %v717_v13  ;;  %vm801_vm2 = vcmp.lt.s32.totalorder %v3161_v29, 1  ;;  %v953_v51 = vadd.s32 1, %v2482_v25  ;;  %vm804_vm3 = vcmp.lt.s32.totalorder %v3161_v29, 4 }
  0xfa   : > { %v721_v32 = vclz %v720_v45  ;;  %v608_v47 = vxor.u32 2147483648, %v603_v3  ;;  %v612_v35 = vsel %vm610_vm1, %v611_v4, %v603_v3  ;;  %v784_v7 = vsub.s32 32, %v783_v63 }
  0xfb   : > { %v786_v12 = vshll.u32 %v2723_v46, %v783_v63  ;;  %v789_v41 = vshll.u32 %v2724_v48, %v783_v63  ;;  %v792_v16 = vshll.u32 %v2725_v52, %v783_v63  ;;  %vm802_vm5 = vcmp.lt.s32.totalorder %v3161_v29, 2 }
  0xfc   : > { %v2477_v2 = vadd.s32 4294967294, %v721_v32  ;;  %v609_v10 = vsel %vm607_vm0, %v595_v36, %v608_v47  ;;  %v787_v6 = vshrl.u32 %v2724_v48, %v784_v7  ;;  %v795_v34 = vshll.u32 %v2726_v55, %v783_v63 }
  0xfd   : > { %v613_v43 = vsel %vm606_vm13, %v609_v10, %v612_v35  ;;  %v790_v9 = vshrl.u32 %v2725_v52, %v784_v7  ;;  %v793_v42 = vshrl.u32 %v2726_v55, %v784_v7  ;;  %v796_v49 = vshrl.u32 %v2727_v58, %v784_v7 }
  0xfe   : > { %vm2478_vm4 = vcmp.lt.s32.totalorder %v2477_v2, 0  ;;  %v614_v37 = vsel %vm604_vm12, nan, %v613_v43  ;;  %v788_v11 = vor.u32 %v787_v6, %v786_v12  ;;  %v798_v39 = vshll.u32 %v2727_v58, %v783_v63 }
  0xff   : > { %v724_v56 = vsel %vm2478_vm4, 0, %v2477_v2  ;;  %1620 = vmatpush.msra.mxu1 %v614_v37  ;;  %v791_v23 = vor.u32 %v790_v9, %v789_v41  ;;  %v799_v20 = vshrl.u32 %v2728_v61, %v784_v7  ;;  %v785_v22 = vshrl.u32 %v2723_v46, %v784_v7 }
 0x100   : > { %v725_v33 = vsub.s32 32, %v724_v56  ;;  %v726_v8 = vshll.u32 %v717_v13, %v724_v56  ;;  %v729_v21 = vsub.s32 4294967266, %v724_v56  ;;  %v794_v27 = vor.u32 %v793_v42, %v792_v16 }
 0x101   : > { %v797_v15 = vor.u32 %v796_v49, %v795_v34  ;;  %vm954_vm6 = vcmp.gt.s32.totalorder %v953_v51, 0  ;;  %v800_v57 = vor.u32 %v799_v20, %v798_v39  ;;  %v809_v36 = vsel %vm801_vm2, %v788_v11, %v791_v23 }
 0x102   : > { %v727_v17 = vshrl.u32 %v709_v28, %v725_v33  ;;  %v730_v60 = vadd.s32 127, %v729_v21  ;;  %vm803_vm7 = vcmp.lt.s32.totalorder %v3161_v29, 3  ;;  %v805_v53 = vsel %vm801_vm2, %v785_v22, %v788_v11 }
 0x103   : > { %v806_v62 = vsel %vm804_vm3, %v794_v27, 2102212464  ;;  %v810_v44 = vsel %vm804_vm3, %v797_v15, 920167782  ;;  %v813_v3 = vsel %vm801_vm2, %v791_v23, %v794_v27  ;;  %v955_v4 = vsel %vm954_vm6, %v953_v51, 0 }
 0x104   : > { %v728_v24 = vor.u32 %v727_v17, %v726_v8  ;;  %v731_v13 = vshll.u32 %v730_v60, 23  ;;  %v811_v25 = vsel %vm803_vm7, %v794_v27, %v810_v44  ;;  %v807_v28 = vsel %vm803_vm7, %v791_v23, %v806_v62 }
 0x105   : > { %v812_v32 = vsel %vm802_vm5, %v809_v36, %v811_v25  ;;  %v814_v47 = vsel %vm804_vm3, %v800_v57, 1326507024  ;;  %v818_v12 = vand.u32 65535, %v3165_v19  ;;  %v819_v43 = vshrl.u32 %v3165_v19, 16 }
 0x106   : > { %v732_v40 = vor.u32 4788187, %v731_v13  ;;  %v735_v45 = vcvt.s32.f32 %v728_v24  ;;  %v815_v35 = vsel %vm803_vm7, %v797_v15, %v814_v47  ;;  %v842_v2 = vand.u32 65535, %v812_v32 }
 0x107   : > { %v843_v10 = vshrl.u32 %v812_v32, 16  ;;  %v816_v7 = vsel %vm802_vm5, %v813_v3, %v815_v35  ;;  %v3208_v51 = vand.u32 31, %v955_v4  ;;  %v3210_v16 = vand.u32 3, %v742_v54 }
 0x108   : > { %v733_v63 = vand.u32 2147483647, %v732_v40  ;;  %v820_v37 = vand.u32 65535, %v816_v7  ;;  %v821_v56 = vshrl.u32 %v816_v7, 16  ;;  %v3214_v6 = vsel %vm802_vm5, %v805_v53, %v807_v28 }
 0x109   : > { %v845_v34 = vmul.u32 %v843_v10, %v818_v12  ;;  %v3216_v33 = vshrl.u32 %v955_v4, 5  ;;  %v3220_v8 = vshll.u32 %v951_v0, 8  ;;  %v844_v42 = vmul.u32 %v842_v2, %v818_v12 }
 0x10a   : > { %v736_v41 = vmul.f32 %v735_v45, %v733_v63  ;;  %v823_v9 = vmul.u32 %v821_v56, %v818_v12  ;;  %v824_v11 = vmul.u32 %v820_v37, %v819_v43  ;;  %v846_v49 = vmul.u32 %v842_v2, %v819_v43 }
 0x10b   : > { %v847_v54 = vmul.u32 %v843_v10, %v819_v43  ;;  %v848_v39 = vshll.u32 %v845_v34, 16  ;;  %v3223_v17 = vsub.s32 32, %v3208_v51  ;;  %v822_v60 = vmul.u32 %v820_v37, %v818_v12 }
 0x10c   : > { %v737_v21 = vxor.u32 2147483648, %v736_v41  ;;  %v825_v23 = vmul.u32 %v821_v56, %v819_v43  ;;  %v826_v20 = vshll.u32 %v823_v9, 16  ;;  %v828_v0 = vshll.u32 %v824_v11, 16 }
 0x10d   : > { %v849_v22 = vshrl.u32 %v845_v34, 16  ;;  %vm852_vm8 = vc.u32 %v844_v42, %v848_v39  ;;  %v850_v57 = vshll.u32 %v846_v49, 16  ;;  %v854_v36 = vadd.s32 %v848_v39, %v844_v42 }
 0x10e   : > { %v738_v29 = vsel %vm617_vm10, %v737_v21, %v736_v41  ;;  %vm830_vm9 = vc.u32 %v822_v60, %v826_v20  ;;  %v832_v15 = vadd.s32 %v826_v20, %v822_v60  ;;  %v853_v24 = vsel %vm852_vm8, 1, %v2721_v1 }
 0x10f   : > { %v741_v30 = vsel %vm3148_vm11, %v2811_v18, %v738_v29  ;;  %v831_v13 = vsel %vm830_vm9, 1, %v2721_v1  ;;  %v855_v53 = vadd.s32 %v853_v24, %v847_v54  ;;  %v827_v25 = vshrl.u32 %v823_v9, 16 }
 0x110   : > { %v743_v27 = vmul.f32 %v741_v30, %v741_v30  ;;  %v833_v40 = vadd.s32 %v831_v13, %v825_v23  ;;  %vm834_vm10 = vc.u32 %v832_v15, %v828_v0  ;;  %v829_v50 = vshrl.u32 %v824_v11, 16 }
 0x111   : > { %v835_v3 = vsel %vm834_vm10, 1, %v2721_v1  ;;  %vm856_vm11 = vc.u32 %v854_v36, %v850_v57  ;;  %v851_v47 = vshrl.u32 %v846_v49, 16  ;;  %v3234_v63 = vadd.s32 %v854_v36, %v850_v57 }
 0x112   : > { %v744_v62 = vmul.f32 -0.001358992, %v743_v27  ;;  %v751_v44 = vmul.f32 -0.00019511016, %v743_v27  ;;  %v837_v28 = vadd.s32 %v835_v3, %v833_v40  ;;  %v857_v32 = vsel %vm856_vm11, 1, %v2721_v1 }
 0x113   : > { %v859_v35 = vadd.s32 %v857_v32, %v855_v53  ;;  %v961_v2 = vshrl.u32 %v2724_v48, %v3223_v17  ;;  %v964_v43 = vshrl.u32 %v2725_v52, %v3223_v17  ;;  %v960_v37 = vshll.u32 %v2723_v46, %v3208_v51 }
 0x114   : > { %v745_v4 = vadd.f32 0.041655596, %v744_v62  ;;  %v752_v45 = vadd.f32 0.008332121, %v751_v44  ;;  %v838_v12 = vadd.s32 %v837_v28, %v827_v25  ;;  %v963_v56 = vshll.u32 %v2724_v48, %v3208_v51 }
 0x115   : > { %v860_v41 = vadd.s32 %v859_v35, %v849_v22  ;;  %v966_v34 = vshll.u32 %v2725_v52, %v3208_v51  ;;  %v967_v42 = vshrl.u32 %v2726_v55, %v3223_v17  ;;  %v3248_v54 = vor.u32 %v961_v2, %v960_v37 }
 0x116   : > { %v746_v10 = vmul.f32 %v745_v4, %v743_v27  ;;  %v753_v7 = vmul.f32 %v752_v45, %v743_v27  ;;  %v839_v11 = vadd.s32 %v838_v12, %v829_v50  ;;  %v969_v39 = vshll.u32 %v2726_v55, %v3208_v51 }
 0x117   : > { %v861_v49 = vadd.s32 %v860_v41, %v851_v47  ;;  %v970_v29 = vshrl.u32 %v2727_v58, %v3223_v17  ;;  %v3255_v20 = vor.u32 %v964_v43, %v963_v56  ;;  %vm758_vm13 = vweird.f32 %v2811_v18 }
 0x118   : > { %v747_v21 = vadd.f32 -0.4999988, %v746_v10  ;;  %v754_v9 = vadd.f32 -0.16666654, %v753_v7  ;;  %vm864_vm12 = vc.u32 %v839_v11, %v3234_v63  ;;  %v972_v15 = vshll.u32 %v2727_v58, %v3208_v51 }
 0x119   : > { %v865_v0 = vadd.s32 1, %v861_v49  ;;  %v971_v22 = vor.u32 %v970_v29, %v969_v39  ;;  %v973_v24 = vshrl.u32 %v2728_v61, %v3223_v17  ;;  %v862_v36 = vmul.u32 %v3165_v19, %v3214_v6 }
 0x11a   : > { %v748_v60 = vmul.f32 %v747_v21, %v743_v27  ;;  %v755_v23 = vmul.f32 %v754_v9, %v743_v27  ;;  %v3264_v27 = vor.u32 %v967_v42, %v966_v34  ;;  %vm760_vm14 = vcmp.lt.s32.totalorder %v3210_v16, 2 }
 0x11b   : > { %v866_v53 = vsel %vm864_vm12, %v865_v0, %v861_v49  ;;  %v974_v62 = vor.u32 %v973_v24, %v972_v15  ;;  %vm975_vm15 = vcmp.lt.s32.totalorder %v3216_v33, 1  ;;  %vm978_vm0 = vcmp.lt.s32.totalorder %v3216_v33, 4 }
 0x11c   : > { %v749_v13 = vadd.f32 1.0, %v748_v60  ;;  %v756_v57 = vadd.f32 1.0, %v755_v23  ;;  %v867_v25 = vadd.s32 %v866_v53, %v862_v36  ;;  %vm976_vm1 = vcmp.lt.s32.totalorder %v3216_v33, 2 }
 0x11d   : > { %vm977_vm2 = vcmp.lt.s32.totalorder %v3216_v33, 3  ;;  %v983_v19 = vsel %vm975_vm15, %v3248_v54, %v3255_v20  ;;  %v984_v51 = vsel %vm978_vm0, %v971_v22, 920167782  ;;  %v987_v3 = vsel %vm975_vm15, %v3255_v20, %v3264_v27 }
 0x11e   : > { %v757_v44 = vmul.f32 %v756_v57, %v741_v30  ;;  %v765_v40 = vxor.u32 2147483648, %v749_v13  ;;  %v868_v50 = vadd.s32 536870912, %v867_v25  ;;  %v985_v30 = vsel %vm977_vm2, %v3264_v27, %v984_v51 }
 0x11f   : > { %vm761_vm3 = vcmp.eq.s32.totalorder %v3210_v16, 0  ;;  %vm764_vm4 = vcmp.eq.s32.totalorder %v3210_v16, 2  ;;  %v986_v4 = vsel %vm976_vm1, %v983_v19, %v985_v30  ;;  %v988_v45 = vsel %vm978_vm0, %v974_v62, 1326507024  ;;  %v2693_v30 = vld [vmem:[%s4076_s0] sm:$0x77] }
 0x120   : > { %v762_v6 = vxor.u32 2147483648, %v757_v44  ;;  %v766_v32 = vsel %vm764_vm4, %v765_v40, %v757_v44  ;;  %v3290_v47 = vshrl.u32 %v868_v50, 30  ;;  %v989_v35 = vsel %vm977_vm2, %v971_v22, %v988_v45 }
 0x121   : > { %v990_v10 = vsel %vm976_vm1, %v987_v3, %v989_v35  ;;  %v992_v7 = vand.u32 65535, %v3220_v8  ;;  %v1017_v12 = vshrl.u32 %v986_v4, 16  ;;  %v993_v56 = vshrl.u32 %v3220_v8, 16 }
 0x122   : > { %v763_v28 = vsel %vm761_vm3, %v749_v13, %v762_v6  ;;  %v870_v41 = vshll.u32 %v3290_v47, 30  ;;  %v994_v37 = vand.u32 65535, %v990_v10  ;;  %v995_v34 = vshrl.u32 %v990_v10, 16 }
 0x123   : > { %v767_v2 = vsel %vm760_vm14, %v763_v28, %v766_v32  ;;  %v1019_v21 = vmul.u32 %v1017_v12, %v992_v7  ;;  %v1016_v16 = vand.u32 65535, %v986_v4  ;;  %v959_v29 = vshrl.u32 %v2723_v46, %v3223_v17  ;;  %v3315_v4 = vld [vmem:[%s4076_s0 + $0x8] sm:$0x77] }
 0x124   : > { %v768_v43 = vsel %vm758_vm13, nan, %v767_v2  ;;  %v871_v9 = vsub.s32 %v867_v25, %v870_v41  ;;  %v997_v42 = vmul.u32 %v995_v34, %v992_v7  ;;  %v998_v49 = vmul.u32 %v994_v37, %v993_v56 }
 0x125   : > { %1649 = vmatpush.msra.mxu2 %v768_v43  ;;  %v863_v18 = vadd.s32 %v3234_v63, %v839_v11  ;;  %v996_v60 = vmul.u32 %v994_v37, %v992_v7  ;;  %v1022_v0 = vshll.u32 %v1019_v21, 16  ;;  %v999_v15 = vmul.u32 %v995_v34, %v993_v56 }
 0x126   : > { %vm872_vm5 = vcmp.lt.s32.totalorder %v871_v9, 0  ;;  %v873_v39 = vsub.s32 0, %v871_v9  ;;  %v1000_v23 = vshll.u32 %v997_v42, 16  ;;  %v1018_v24 = vmul.u32 %v1016_v16, %v992_v7 }
 0x127   : > { %v1020_v13 = vmul.u32 %v1016_v16, %v993_v56  ;;  %v1002_v36 = vshll.u32 %v998_v49, 16  ;;  %v1001_v62 = vshrl.u32 %v997_v42, 16  ;;  %v1021_v40 = vmul.u32 %v1017_v12, %v993_v56 }
 0x128   : > { %v874_v22 = vsel %vm872_vm5, %v873_v39, %v871_v9  ;;  %vm1004_vm6 = vc.u32 %v996_v60, %v1000_v23  ;;  %v1006_v53 = vadd.s32 %v1000_v23, %v996_v60  ;;  %vm1026_vm7 = vc.u32 %v1018_v24, %v1022_v0 }
 0x129   : > { %v875_v57 = vclz %v874_v22  ;;  %v1005_v44 = vsel %vm1004_vm6, 1, %v2721_v1  ;;  %v1027_v63 = vsel %vm1026_vm7, 1, %v2721_v1  ;;  %v1024_v19 = vshll.u32 %v1020_v13, 16 }
 0x12a   : > { %v1007_v17 = vadd.s32 %v1005_v44, %v999_v15  ;;  %vm1008_vm8 = vc.u32 %v1006_v53, %v1002_v36  ;;  %v1028_v51 = vadd.s32 %v1022_v0, %v1018_v24  ;;  %v1029_v6 = vadd.s32 %v1027_v63, %v1021_v40 }
 0x12b   : > { %v2480_v25 = vadd.s32 4294967294, %v875_v57  ;;  %v1009_v11 = vsel %vm1008_vm8, 1, %v2721_v1  ;;  %v924_v3 = vperm.slane %v2693_v30, 5  ;;  %v925_v45 = vperm.slane %v3315_v4, 1 }
 0x12c   : > { %v1011_v50 = vadd.s32 %v1009_v11, %v1007_v17  ;;  %v979_v32 = vsel %vm975_vm15, %v959_v29, %v3248_v54  ;;  %v980_v35 = vsel %vm978_vm0, %v3264_v27, 2102212464  ;;  %vm1030_vm10 = vc.u32 %v1028_v51, %v1024_v19 }
 0x12d   : > { %vm2481_vm9 = vcmp.lt.s32.totalorder %v2480_v25, 0  ;;  %v1003_v7 = vshrl.u32 %v998_v49, 16  ;;  %v1023_v43 = vshrl.u32 %v1019_v21, 16  ;;  %v1031_v41 = vsel %vm1030_vm10, 1, %v2721_v1 }
 0x12e   : > { %v878_v28 = vsel %vm2481_vm9, 0, %v2480_v25  ;;  %v1012_v12 = vadd.s32 %v1011_v50, %v1001_v62  ;;  %v932_v37 = vperm.slane %v924_v3, 1  ;;  %v933_v56 = vperm.slane %v925_v45, 1 }
 0x12f   : > { %v879_v2 = vsub.s32 32, %v878_v28  ;;  %v883_v10 = vsub.s32 4294967266, %v878_v28  ;;  %v880_v34 = vshll.u32 %v871_v9, %v878_v28  ;;  %v1033_v39 = vadd.s32 %v1031_v41, %v1029_v6  ;;  %v3335_v9 = vld [vmem:[%s4078_s2] sm:$0xff] }
 0x130   : > { %v981_v54 = vsel %vm977_vm2, %v3255_v20, %v980_v35  ;;  %v3328_v29 = vadd.s32 %v1012_v12, %v1003_v7  ;;  %v1025_v27 = vshrl.u32 %v1020_v13, 16  ;;  %v936_v60 = vmul.f32 %v932_v37, %v2794_v5 }
 0x131   : > { %v881_v16 = vshrl.u32 %v863_v18, %v879_v2  ;;  %v884_v42 = vadd.s32 127, %v883_v10  ;;  %v1034_v21 = vadd.s32 %v1033_v39, %v1023_v43  ;;  %v937_v0 = vmul.f32 %v933_v56, %v2794_v5 }
 0x132   : > { %vm1563_vm11 = vcmask 64512   ;;  %v1032_v18 = vadd.s32 %v1028_v51, %v1024_v19  ;;  %v3338_v22 = vsub.f32 %v936_v60, %v2801_v14  ;;  %v982_v15 = vsel %vm976_vm1, %v979_v32, %v981_v54 }
 0x133   : > { %v882_v49 = vor.u32 %v881_v16, %v880_v34  ;;  %v885_v23 = vshll.u32 %v884_v42, 23  ;;  %2494 = vmatmul.msk.f32.vlgmr.msra.gmra.mxu0 %vm1563_vm11, %v3335_v9  ;;  %2498 = vmatmul.msk.f32.vlgmr.msra.gmra.mxu1 %vm1563_vm11, %v3335_v9  ;;  %v1035_v24 = vadd.s32 %v1034_v21, %v1025_v27  ;;  %v3347_v13 = vsub.f32 %v937_v0, %v2801_v14 }
 0x134   : > { %2502 = vmatmul.msk.f32.vlgmr.msra.gmra.mxu2 %vm1563_vm11, %v3335_v9  ;;  %vm1038_vm12 = vc.u32 %v3328_v29, %v1032_v18  ;;  %v1097_v57 = vand.u32 2147483647, %v3338_v22  ;;  %v1100_v36 = vand.u32 2139095040, %v3338_v22  ;;  %v893_v40 = vsub.s32 4, %v3290_v47 }
 0x135   : > { %v886_v20 = vor.u32 4788187, %v885_v23  ;;  %v889_v62 = vcvt.s32.f32 %v882_v49  ;;  %v1039_v44 = vadd.s32 1, %v1035_v24  ;;  %v1036_v33 = vmul.u32 %v3220_v8, %v982_v15 }
 0x136   : > { %v1101_v25 = vshrl.u32 %v1100_v36, 23  ;;  %v1104_v17 = vand.u32 8388607, %v1097_v57  ;;  %v1254_v19 = vand.u32 2139095040, %v3347_v13  ;;  %vm771_vm13 = vcmp.lt.s32.totalorder %v3127_v31, 0 }
 0x137   : > { %v887_v53 = vand.u32 2147483647, %v886_v20  ;;  %v1040_v11 = vsel %vm1038_vm12, %v1039_v44, %v1035_v24  ;;  %v894_v3 = vsel %vm771_vm13, %v893_v40, %v3290_v47  ;;  %vm3363_vm14 = vcmp.le.f32.partialorder %v769_v38, 0.7853982 }
 0x138   : > { %v1041_v51 = vadd.s32 %v1040_v11, %v1036_v33  ;;  %v2485_v6 = vadd.s32 4294967169, %v1101_v25  ;;  %v1105_v30 = vor.u32 8388608, %v1104_v17  ;;  %v1255_v35 = vshrl.u32 %v1254_v19, 23 }
 0x139   : > { %v890_v63 = vmul.f32 %v889_v62, %v887_v53  ;;  %v1251_v7 = vand.u32 2147483647, %v3347_v13  ;;  %v896_v47 = vsel %vm3363_vm14, 0, %v894_v3  ;;  %vm3381_vm0 = vcmp.le.f32.partialorder %v943_v26, 0.7853982 }
 0x13a   : > { %v1042_v45 = vadd.s32 536870912, %v1041_v51  ;;  %v1107_v28 = vadd.s32 1, %v2485_v6  ;;  %v3377_v43 = vshll.u32 %v1105_v30, 8  ;;  %vm945_vm1 = vcmp.lt.s32.totalorder %v3135_v59, 0 }
 0x13b   : > { %v891_v50 = vxor.u32 2147483648, %v890_v63  ;;  %v2488_v39 = vadd.s32 4294967169, %v1255_v35  ;;  %v3386_v54 = vand.u32 3, %v896_v47  ;;  %v3392_v49 = vand.u32 8388607, %v1251_v7 }
 0x13c   : > { %v1043_v10 = vshrl.u32 %v1042_v45, 30  ;;  %vm1108_vm15 = vcmp.gt.s32.totalorder %v1107_v28, 0  ;;  %v1037_v21 = vadd.s32 %v1032_v18, %v3328_v29  ;;  %v3396_v0 = vand.u32 65535, %v3377_v43 }
 0x13d   : > { %v892_v32 = vsel %vm771_vm13, %v891_v50, %v890_v63  ;;  %v1109_v12 = vsel %vm1108_vm15, %v1107_v28, 0  ;;  %v3405_v24 = vshrl.u32 %v3377_v43, 16  ;;  %v3408_v44 = vadd.s32 1, %v2488_v39 }
 0x13e   : > { %v3370_v2 = vsel %vm3363_vm14, %v3127_v31, %v892_v32  ;;  %v1044_v37 = vshll.u32 %v1043_v10, 30  ;;  %v1067_v56 = vsub.s32 4, %v1043_v10  ;;  %v1111_v34 = vand.u32 31, %v1109_v12 }
 0x13f   : > { %v897_v38 = vmul.f32 %v3370_v2, %v3370_v2  ;;  %v3411_v18 = vshrl.u32 %v1109_v12, 5  ;;  %vm918_vm3 = vcmp.eq.s32.totalorder %v3386_v54, 2  ;;  %vm915_vm4 = vcmp.eq.s32.totalorder %v3386_v54, 0 }
 0x140   : > { %v3388_v27 = vsub.s32 %v1041_v51, %v1044_v37  ;;  %v1112_v60 = vsub.s32 32, %v1111_v34  ;;  %v3402_v15 = vsel %vm945_vm1, %v1067_v56, %v1043_v10  ;;  %v1114_v40 = vshll.u32 %v2723_v46, %v1111_v34 }
 0x141   : > { %v898_v16 = vmul.f32 -0.001358992, %v897_v38  ;;  %v905_v42 = vmul.f32 -0.00019511016, %v897_v38  ;;  %v1070_v11 = vsel %vm3381_vm0, 0, %v3402_v15  ;;  %v1117_v6 = vshll.u32 %v2724_v48, %v1111_v34 }
 0x142   : > { %vm1046_vm2 = vcmp.lt.s32.totalorder %v3388_v27, 0  ;;  %v1047_v20 = vsub.s32 0, %v3388_v27  ;;  %v1115_v62 = vshrl.u32 %v2724_v48, %v1112_v60  ;;  %v1118_v33 = vshrl.u32 %v2725_v52, %v1112_v60 }
 0x143   : > { %v899_v26 = vadd.f32 0.041655596, %v898_v16  ;;  %v906_v23 = vadd.f32 0.008332121, %v905_v42  ;;  %v1113_v19 = vshrl.u32 %v2723_v46, %v1112_v60  ;;  %v1121_v50 = vshrl.u32 %v2726_v55, %v1112_v60 }
 0x144   : > { %v1048_v29 = vsel %vm1046_vm2, %v1047_v20, %v3388_v27  ;;  %v1116_v51 = vor.u32 %v1115_v62, %v1114_v40  ;;  %vm914_vm5 = vcmp.lt.s32.totalorder %v3386_v54, 2  ;;  %v1124_v28 = vshrl.u32 %v2727_v58, %v1112_v60 }
 0x145   : > { %v900_v36 = vmul.f32 %v899_v26, %v897_v38  ;;  %v907_v53 = vmul.f32 %v906_v23, %v897_v38  ;;  %v1049_v63 = vclz %v1048_v29  ;;  %vm912_vm6 = vweird.f32 %v3127_v31 }
 0x146   : > { %v1119_v8 = vor.u32 %v1118_v33, %v1117_v6  ;;  %v1120_v32 = vshll.u32 %v2725_v52, %v1111_v34  ;;  %v1123_v35 = vshll.u32 %v2726_v55, %v1111_v34  ;;  %v1127_v10 = vshrl.u32 %v2728_v61, %v1112_v60 }
 0x147   : > { %v901_v25 = vadd.f32 -0.4999988, %v900_v36  ;;  %v908_v17 = vadd.f32 -0.16666654, %v907_v53  ;;  %v2483_v45 = vadd.s32 4294967294, %v1049_v63  ;;  %v1126_v37 = vshll.u32 %v2727_v58, %v1111_v34 }
 0x148   : > { %v1122_v56 = vor.u32 %v1121_v50, %v1120_v32  ;;  %v1125_v16 = vor.u32 %v1124_v28, %v1123_v35  ;;  %vm1129_vm8 = vcmp.lt.s32.totalorder %v3411_v18, 1  ;;  %vm1130_vm9 = vcmp.lt.s32.totalorder %v3411_v18, 2 }
 0x149   : > { %v902_v30 = vmul.f32 %v901_v25, %v897_v38  ;;  %v909_v3 = vmul.f32 %v908_v17, %v897_v38  ;;  %vm2484_vm7 = vcmp.lt.s32.totalorder %v2483_v45, 0  ;;  %v1128_v23 = vor.u32 %v1127_v10, %v1126_v37 }
 0x14a   : > { %v1052_v38 = vsel %vm2484_vm7, 0, %v2483_v45  ;;  %vm1131_vm10 = vcmp.lt.s32.totalorder %v3411_v18, 3  ;;  %vm1132_vm12 = vcmp.lt.s32.totalorder %v3411_v18, 4  ;;  %v1137_v34 = vsel %vm1129_vm8, %v1116_v51, %v1119_v8 }
 0x14b   : > { %v903_v47 = vadd.f32 1.0, %v902_v30  ;;  %v910_v12 = vadd.f32 1.0, %v909_v3  ;;  %v1053_v26 = vsub.s32 32, %v1052_v38  ;;  %v1054_v20 = vshll.u32 %v3388_v27, %v1052_v38 }
 0x14c   : > { %v1057_v36 = vsub.s32 4294967266, %v1052_v38  ;;  %v1134_v29 = vsel %vm1132_vm12, %v1122_v56, 2102212464  ;;  %v1138_v40 = vsel %vm1132_vm12, %v1125_v16, 920167782  ;;  %v1133_v3 = vsel %vm1129_vm8, %v1113_v19, %v1116_v51 }
 0x14d   : > { %v911_v42 = vmul.f32 %v910_v12, %v3370_v2  ;;  %v919_v39 = vxor.u32 2147483648, %v903_v47  ;;  %v1055_v53 = vshrl.u32 %v1037_v21, %v1053_v26  ;;  %v1139_v25 = vsel %vm1131_vm10, %v1122_v56, %v1138_v40 }
 0x14e   : > { %v1058_v62 = vadd.s32 127, %v1057_v36  ;;  %v1141_v21 = vsel %vm1129_vm8, %v1119_v8, %v1122_v56  ;;  %v1140_v6 = vsel %vm1130_vm9, %v1137_v34, %v1139_v25  ;;  %v1142_v50 = vsel %vm1132_vm12, %v1128_v23, 1326507024 }
 0x14f   : > { %v916_v60 = vxor.u32 2147483648, %v911_v42  ;;  %v920_v2 = vsel %vm918_vm3, %v919_v39, %v911_v42  ;;  %v1056_v33 = vor.u32 %v1055_v53, %v1054_v20  ;;  %v1143_v45 = vsel %vm1131_vm10, %v1125_v16, %v1142_v50 }
 0x150   : > { %v1059_v63 = vshll.u32 %v1058_v62, 23  ;;  %v1170_v28 = vand.u32 65535, %v1140_v6  ;;  %v1135_v54 = vsel %vm1131_vm10, %v1119_v8, %v1134_v29  ;;  %v1144_v35 = vsel %vm1130_vm9, %v1141_v21, %v1143_v45 }
 0x151   : > { %v917_v27 = vsel %vm915_vm4, %v903_v47, %v916_v60  ;;  %v1171_v10 = vshrl.u32 %v1140_v6, 16  ;;  %v1148_v31 = vand.u32 65535, %v1144_v35  ;;  %v1149_v47 = vshrl.u32 %v1144_v35, 16 }
 0x152   : > { %v921_v17 = vsel %vm914_vm5, %v917_v27, %v920_v2  ;;  %v1060_v32 = vor.u32 4788187, %v1059_v63  ;;  %v1259_v19 = vor.u32 8388608, %v3392_v49  ;;  %vm1262_vm13 = vcmp.gt.s32.totalorder %v3408_v44, 0 }
 0x153   : > { %v922_v30 = vsel %vm912_vm6, nan, %v921_v17  ;;  %v1063_v12 = vcvt.s32.f32 %v1056_v33  ;;  %v1173_v37 = vmul.u32 %v1171_v10, %v3396_v0  ;;  %v1174_v38 = vmul.u32 %v1170_v28, %v3405_v24 }
 0x154   : > { %1678 = vmatpush.msra.mxu3 %v922_v30  ;;  %v1061_v51 = vand.u32 2147483647, %v1060_v32  ;;  %v3470_v8 = vand.u32 3, %v1070_v11  ;;  %v1151_v56 = vmul.u32 %v1149_v47, %v3396_v0  ;;  %v1152_v16 = vmul.u32 %v1148_v31, %v3405_v24 }
 0x155   : > { %2506 = vmatmul.msk.f32.vlgmr.msra.gmra.mxu3 %vm1563_vm11, %v3335_v9  ;;  %v3474_v9 = vsel %vm1130_vm9, %v1133_v3, %v1135_v54  ;;  %v1172_v39 = vmul.u32 %v1170_v28, %v3396_v0  ;;  %v1175_v26 = vmul.u32 %v1171_v10, %v3405_v24  ;;  %v1176_v23 = vshll.u32 %v1173_v37, 16 }
 0x156   : > { %v1064_v42 = vmul.f32 %v1063_v12, %v1061_v51  ;;  %v1150_v20 = vmul.u32 %v1148_v31, %v3396_v0  ;;  %v1153_v15 = vmul.u32 %v1149_v47, %v3405_v24  ;;  %v1154_v11 = vshll.u32 %v1151_v56, 16 }
 0x157   : > { %v1263_v18 = vsel %vm1262_vm13, %v3408_v44, 0  ;;  %v1178_v60 = vshll.u32 %v1174_v38, 16  ;;  %vm1180_vm14 = vc.u32 %v1172_v39, %v1176_v23  ;;  %v1182_v53 = vadd.s32 %v1176_v23, %v1172_v39 }
 0x158   : > { %v1065_v36 = vxor.u32 2147483648, %v1064_v42  ;;  %v1156_v34 = vshll.u32 %v1152_v16, 16  ;;  %vm1158_vm15 = vc.u32 %v1150_v20, %v1154_v11  ;;  %v1160_v2 = vadd.s32 %v1154_v11, %v1150_v20 }
 0x159   : > { %v1181_v62 = vsel %vm1180_vm14, 1, %v2721_v1  ;;  %v1159_v0 = vsel %vm1158_vm15, 1, %v2721_v1  ;;  %vm1184_vm2 = vc.u32 %v1182_v53, %v1178_v60  ;;  %v1177_v21 = vshrl.u32 %v1173_v37, 16 }
 0x15a   : > { %v1066_v29 = vsel %vm945_vm1, %v1065_v36, %v1064_v42  ;;  %v1183_v24 = vadd.s32 %v1181_v62, %v1175_v26  ;;  %v1161_v40 = vadd.s32 %v1159_v0, %v1153_v15  ;;  %vm1162_vm3 = vc.u32 %v1160_v2, %v1156_v34 }
 0x15b   : > { %v1069_v44 = vsel %vm3381_vm0, %v3135_v59, %v1066_v29  ;;  %v1185_v27 = vsel %vm1184_vm2, 1, %v2721_v1  ;;  %v1163_v25 = vsel %vm1162_vm3, 1, %v2721_v1  ;;  %v1155_v63 = vshrl.u32 %v1151_v56, 16 }
 0x15c   : > { %v1071_v33 = vmul.f32 %v1069_v44, %v1069_v44  ;;  %v1187_v17 = vadd.s32 %v1185_v27, %v1183_v24  ;;  %v1165_v6 = vadd.s32 %v1163_v25, %v1161_v40  ;;  %v1190_v50 = vmul.u32 %v3377_v43, %v3474_v9 }
 0x15d   : > { %v1265_v30 = vand.u32 31, %v1263_v18  ;;  %v1179_v28 = vshrl.u32 %v1174_v38, 16  ;;  %v1157_v32 = vshrl.u32 %v1152_v16, 16  ;;  %v3496_v35 = vadd.s32 %v1182_v53, %v1178_v60 }
 0x15e   : > { %v1072_v3 = vmul.f32 -0.001358992, %v1071_v33  ;;  %v1079_v45 = vmul.f32 -0.00019511016, %v1071_v33  ;;  %v1188_v41 = vadd.s32 %v1187_v17, %v1177_v21  ;;  %v1166_v54 = vadd.s32 %v1165_v6, %v1155_v63 }
 0x15f   : > { %v3498_v10 = vsub.s32 32, %v1265_v30  ;;  %v1268_v12 = vshll.u32 %v2723_v46, %v1265_v30  ;;  %v1271_v9 = vshll.u32 %v2724_v48, %v1265_v30  ;;  %v3512_v26 = vshrl.u32 %v1263_v18, 5 }
 0x160   : > { %v1073_v31 = vadd.f32 0.041655596, %v1072_v3  ;;  %v1080_v47 = vadd.f32 0.008332121, %v1079_v45  ;;  %v1189_v51 = vadd.s32 %v1188_v41, %v1179_v28  ;;  %v3501_v37 = vadd.s32 %v1166_v54, %v1157_v32 }
 0x161   : > { %v1269_v43 = vshrl.u32 %v2724_v48, %v3498_v10  ;;  %v1272_v38 = vshrl.u32 %v2725_v52, %v3498_v10  ;;  %v1275_v39 = vshrl.u32 %v2726_v55, %v3498_v10  ;;  %v1274_v20 = vshll.u32 %v2725_v52, %v1265_v30 }
 0x162   : > { %v1074_v56 = vmul.f32 %v1073_v31, %v1071_v33  ;;  %v1081_v16 = vmul.f32 %v1080_v47, %v1071_v33  ;;  %v1193_v42 = vadd.s32 1, %v1189_v51  ;;  %vm1192_vm0 = vc.u32 %v3501_v37, %v3496_v35 }
 0x163   : > { %v3514_v23 = vor.u32 %v1269_v43, %v1268_v12  ;;  %v3517_v60 = vor.u32 %v1272_v38, %v1271_v9  ;;  %v3519_v34 = vor.u32 %v1275_v39, %v1274_v20  ;;  %v1277_v2 = vshll.u32 %v2726_v55, %v1265_v30 }
 0x164   : > { %v1075_v15 = vadd.f32 -0.4999988, %v1074_v56  ;;  %v1082_v11 = vadd.f32 -0.16666654, %v1081_v16  ;;  %v1194_v36 = vsel %vm1192_vm0, %v1193_v42, %v1189_v51  ;;  %v1278_v62 = vshrl.u32 %v2727_v58, %v3498_v10 }
 0x165   : > { %v1195_v53 = vadd.s32 %v1194_v36, %v1190_v50  ;;  %v1280_v0 = vshll.u32 %v2727_v58, %v1265_v30  ;;  %v1281_v24 = vshrl.u32 %v2728_v61, %v3498_v10  ;;  %vm1283_vm1 = vcmp.lt.s32.totalorder %v3512_v26, 1 }
 0x166   : > { %v1076_v29 = vmul.f32 %v1075_v15, %v1071_v33  ;;  %v1083_v18 = vmul.f32 %v1082_v11, %v1071_v33  ;;  %v1279_v27 = vor.u32 %v1278_v62, %v1277_v2  ;;  %vm1284_vm4 = vcmp.lt.s32.totalorder %v3512_v26, 2 }
 0x167   : > { %v1196_v40 = vadd.s32 536870912, %v1195_v53  ;;  %v1282_v17 = vor.u32 %v1281_v24, %v1280_v0  ;;  %vm1286_vm5 = vcmp.lt.s32.totalorder %v3512_v26, 4  ;;  %vm1285_vm6 = vcmp.lt.s32.totalorder %v3512_v26, 3 }
 0x168   : > { %v1077_v25 = vadd.f32 1.0, %v1076_v29  ;;  %v1084_v21 = vadd.f32 1.0, %v1083_v18  ;;  %v1291_v33 = vsel %vm1283_vm1, %v3514_v23, %v3517_v60  ;;  %v1292_v6 = vsel %vm1286_vm5, %v1279_v27, 920167782 }
 0x169   : > { %v3530_v63 = vshrl.u32 %v1196_v40, 30  ;;  %v1293_v3 = vsel %vm1285_vm6, %v3519_v34, %v1292_v6  ;;  %v1295_v45 = vsel %vm1283_vm1, %v3517_v60, %v3519_v34  ;;  %vm1086_vm7 = vweird.f32 %v3135_v59 }
 0x16a   : > { %v1085_v50 = vmul.f32 %v1084_v21, %v1069_v44  ;;  %v1093_v30 = vxor.u32 2147483648, %v1077_v25  ;;  %v1294_v41 = vsel %vm1284_vm4, %v1291_v33, %v1293_v3  ;;  %v1296_v44 = vsel %vm1286_vm5, %v1282_v17, 1326507024 }
 0x16b   : > { %v1198_v28 = vshll.u32 %v3530_v63, 30  ;;  %vm1088_vm8 = vcmp.lt.s32.totalorder %v3470_v8, 2  ;;  %v1297_v54 = vsel %vm1285_vm6, %v1279_v27, %v1296_v44  ;;  %v3557_v31 = vshll.u32 %v1259_v19, 8 }
 0x16c   : > { %v1090_v32 = vxor.u32 2147483648, %v1085_v50  ;;  %vm1089_vm9 = vcmp.eq.s32.totalorder %v3470_v8, 0  ;;  %vm1092_vm10 = vcmp.eq.s32.totalorder %v3470_v8, 2  ;;  %v1298_v51 = vsel %vm1284_vm4, %v1295_v45, %v1297_v54 }
 0x16d   : > { %v1199_v47 = vsub.s32 %v1195_v53, %v1198_v28  ;;  %v1094_v43 = vsel %vm1092_vm10, %v1093_v30, %v1085_v50  ;;  %v1300_v9 = vand.u32 65535, %v3557_v31  ;;  %v1324_v38 = vand.u32 65535, %v1294_v41 }
 0x16e   : > { %v1091_v12 = vsel %vm1089_vm9, %v1077_v25, %v1090_v32  ;;  %v1301_v49 = vshrl.u32 %v3557_v31, 16  ;;  %v1302_v42 = vand.u32 65535, %v1298_v51  ;;  %v1303_v39 = vshrl.u32 %v1298_v51, 16 }
 0x16f   : > { %v1095_v56 = vsel %vm1088_vm8, %v1091_v12, %v1094_v43  ;;  %vm1200_vm12 = vcmp.lt.s32.totalorder %v1199_v47, 0  ;;  %v1201_v16 = vsub.s32 0, %v1199_v47  ;;  %v1325_v8 = vshrl.u32 %v1294_v41, 16 }
 0x170   : > { %v1096_v19 = vsel %vm1086_vm7, nan, %v1095_v56  ;;  %v1305_v11 = vmul.u32 %v1303_v39, %v1300_v9  ;;  %v1306_v36 = vmul.u32 %v1302_v42, %v1301_v49  ;;  %v1267_v53 = vshrl.u32 %v2723_v46, %v3498_v10 }
 0x171   : > { %1723 = vmatpush.msrb.mxu0 %v1096_v19  ;;  %v1202_v20 = vsel %vm1200_vm12, %v1201_v16, %v1199_v47  ;;  %v1327_v2 = vmul.u32 %v1325_v8, %v1300_v9  ;;  %v1304_v29 = vmul.u32 %v1302_v42, %v1300_v9  ;;  %v1328_v0 = vmul.u32 %v1324_v38, %v1301_v49 }
 0x172   : > { %v1203_v15 = vclz %v1202_v20  ;;  %v1308_v18 = vshll.u32 %v1305_v11, 16  ;;  %v1191_v59 = vadd.s32 %v3496_v35, %v3501_v37  ;;  %v1307_v24 = vmul.u32 %v1303_v39, %v1301_v49 }
 0x173   : > { %v1326_v40 = vmul.u32 %v1324_v38, %v1300_v9  ;;  %v1330_v27 = vshll.u32 %v1327_v2, 16  ;;  %v1310_v25 = vshll.u32 %v1306_v36, 16  ;;  %v1329_v6 = vmul.u32 %v1325_v8, %v1301_v49 }
 0x174   : > { %v2486_v62 = vadd.s32 4294967294, %v1203_v15  ;;  %vm1312_vm14 = vc.u32 %v1304_v29, %v1308_v18  ;;  %v1314_v21 = vadd.s32 %v1308_v18, %v1304_v29  ;;  %v1332_v3 = vshll.u32 %v1328_v0, 16 }
 0x175   : > { %v1313_v33 = vsel %vm1312_vm14, 1, %v2721_v1  ;;  %vm1334_vm15 = vc.u32 %v1326_v40, %v1330_v27  ;;  %v1336_v37 = vadd.s32 %v1330_v27, %v1326_v40  ;;  %v1288_v54 = vsel %vm1286_vm5, %v3519_v34, 2102212464 }
 0x176   : > { %vm2487_vm13 = vcmp.lt.s32.totalorder %v2486_v62, 0  ;;  %v1315_v30 = vadd.s32 %v1313_v33, %v1307_v24  ;;  %vm1316_vm2 = vc.u32 %v1314_v21, %v1310_v25  ;;  %v1335_v35 = vsel %vm1334_vm15, 1, %v2721_v1 }
 0x177   : > { %v1206_v17 = vsel %vm2487_vm13, 0, %v2486_v62  ;;  %v1317_v44 = vsel %vm1316_vm2, 1, %v2721_v1  ;;  %v1337_v32 = vadd.s32 %v1335_v35, %v1329_v6  ;;  %v1309_v51 = vshrl.u32 %v1305_v11, 16 }
 0x178   : > { %v1207_v10 = vsub.s32 32, %v1206_v17  ;;  %v1211_v50 = vsub.s32 4294967266, %v1206_v17  ;;  %v1208_v45 = vshll.u32 %v1199_v47, %v1206_v17  ;;  %v1319_v12 = vadd.s32 %v1317_v44, %v1315_v30 }
 0x179   : > { %vm1338_vm3 = vc.u32 %v1336_v37, %v1332_v3  ;;  %v926_v38 = vperm.slane %v3315_v4, 5  ;;  %v1311_v56 = vshrl.u32 %v1306_v36, 16  ;;  %v1331_v49 = vshrl.u32 %v1327_v2, 16 }
 0x17a   : > { %v1209_v28 = vshrl.u32 %v1191_v59, %v1207_v10  ;;  %v1212_v41 = vadd.s32 127, %v1211_v50  ;;  %v1339_v47 = vsel %vm1338_vm3, 1, %v2721_v1  ;;  %v1320_v16 = vadd.s32 %v1319_v12, %v1309_v51 }
 0x17b   : > { %v1341_v19 = vadd.s32 %v1339_v47, %v1337_v32  ;;  %v1287_v39 = vsel %vm1283_vm1, %v1267_v53, %v3514_v23  ;;  %v1289_v34 = vsel %vm1285_vm6, %v3517_v60, %v1288_v54  ;;  %v934_v8 = vperm.slane %v926_v38, 1 }
 0x17c   : > { %v1210_v43 = vor.u32 %v1209_v28, %v1208_v45  ;;  %v1213_v9 = vshll.u32 %v1212_v41, 23  ;;  %v1321_v20 = vadd.s32 %v1320_v16, %v1311_v56  ;;  %v1333_v15 = vshrl.u32 %v1328_v0, 16 }
 0x17d   : > { %v1342_v11 = vadd.s32 %v1341_v19, %v1331_v49  ;;  %v1340_v4 = vadd.s32 %v1336_v37, %v1332_v3  ;;  %v938_v36 = vmul.f32 %v934_v8, %v2794_v5  ;;  %v1290_v2 = vsel %vm1284_vm4, %v1287_v39, %v1289_v34 }
 0x17e   : > { %v1214_v42 = vor.u32 4788187, %v1213_v9  ;;  %v1217_v29 = vcvt.s32.f32 %v1210_v43  ;;  %v1221_v24 = vsub.s32 4, %v3530_v63  ;;  %v1344_v0 = vmul.u32 %v3557_v31, %v1290_v2 }
 0x17f   : > { %v1343_v18 = vadd.s32 %v1342_v11, %v1333_v15  ;;  %vm1346_vm0 = vc.u32 %v1321_v20, %v1340_v4  ;;  %v3589_v23 = vsub.f32 %v938_v36, %v2801_v14  ;;  %vm1099_vm1 = vcmp.lt.s32.totalorder %v3338_v22, 0 }
 0x180   : > { %v1215_v62 = vand.u32 2147483647, %v1214_v42  ;;  %vm3597_vm4 = vcmp.le.f32.partialorder %v1097_v57, 0.7853982  ;;  %v1222_v31 = vsel %vm1099_vm1, %v1221_v24, %v3530_v63  ;;  %vm1240_vm9 = vweird.f32 %v3338_v22 }
 0x181   : > { %v1347_v53 = vadd.s32 1, %v1343_v18  ;;  %v1408_v40 = vand.u32 2139095040, %v3589_v23  ;;  %v1224_v3 = vsel %vm3597_vm4, 0, %v1222_v31  ;;  %v1405_v45 = vand.u32 2147483647, %v3589_v23 }
 0x182   : > { %v1218_v59 = vmul.f32 %v1217_v29, %v1215_v62  ;;  %v1241_v44 = vand.u32 3, %v1224_v3  ;;  %v1345_v49 = vadd.s32 %v1340_v4, %v1321_v20  ;;  %vm3671_vm3 = vcmp.le.f32.partialorder %v1251_v7, 0.7853982 }
 0x183   : > { %v1348_v5 = vsel %vm1346_vm0, %v1347_v53, %v1343_v18  ;;  %v1409_v25 = vshrl.u32 %v1408_v40, 23  ;;  %v1412_v54 = vand.u32 8388607, %v1405_v45  ;;  %vm1253_vm0 = vcmp.lt.s32.totalorder %v3347_v13, 0 }
 0x184   : > { %v1219_v60 = vxor.u32 2147483648, %v1218_v59  ;;  %v1349_v14 = vadd.s32 %v1348_v5, %v1344_v0  ;;  %vm1242_vm7 = vcmp.lt.s32.totalorder %v1241_v44, 2  ;;  %vm1243_vm8 = vcmp.eq.s32.totalorder %v1241_v44, 0 }
 0x185   : > { %v2491_v6 = vadd.s32 4294967169, %v1409_v25  ;;  %vm1246_vm10 = vcmp.eq.s32.totalorder %v1241_v44, 2  ;;  %v1413_v42 = vor.u32 8388608, %v1412_v54 }
 0x186   : > { %v1220_v27 = vsel %vm1099_vm1, %v1219_v60, %v1218_v59  ;;  %v1350_v33 = vadd.s32 536870912, %v1349_v14 }
 0x187   : > { %v1223_v21 = vsel %vm3597_vm4, %v3338_v22, %v1220_v27  ;;  %v1415_v57 = vadd.s32 1, %v2491_v6  ;;  %v3651_v22 = vshll.u32 %v1413_v42, 8 }
 0x188   : > { %v1225_v17 = vmul.f32 %v1223_v21, %v1223_v21  ;;  %v3605_v30 = vshrl.u32 %v1350_v33, 30 }
 0x189   : > { %vm1416_vm5 = vcmp.gt.s32.totalorder %v1415_v57, 0 }
 0x18a   : > { %v1226_v10 = vmul.f32 -0.001358992, %v1225_v17  ;;  %v1233_v50 = vmul.f32 -0.00019511016, %v1225_v17  ;;  %v1352_v28 = vshll.u32 %v3605_v30, 30  ;;  %v1417_v51 = vsel %vm1416_vm5, %v1415_v57, 0 }
 0x18b   : > { %v1419_v47 = vand.u32 31, %v1417_v51  ;;  %v3614_v8 = vshrl.u32 %v1417_v51, 5 }
 0x18c   : > { %v1227_v35 = vadd.f32 0.041655596, %v1226_v10  ;;  %v1234_v37 = vadd.f32 0.008332121, %v1233_v50  ;;  %v1353_v32 = vsub.s32 %v1349_v14, %v1352_v28 }
 0x18d   : > { %v3616_v15 = vsub.s32 32, %v1419_v47  ;;  %v1422_v62 = vshll.u32 %v2723_v46, %v1419_v47  ;;  %v1425_v29 = vshll.u32 %v2724_v48, %v1419_v47  ;;  %v1428_v36 = vshll.u32 %v2725_v52, %v1419_v47 }
 0x18e   : > { %v1228_v41 = vmul.f32 %v1227_v35, %v1225_v17  ;;  %v1235_v63 = vmul.f32 %v1234_v37, %v1225_v17  ;;  %vm1354_vm6 = vcmp.lt.s32.totalorder %v1353_v32, 0  ;;  %v1355_v9 = vsub.s32 0, %v1353_v32 }
 0x18f   : > { %v1423_v20 = vshrl.u32 %v2724_v48, %v3616_v15  ;;  %v1431_v4 = vshll.u32 %v2726_v55, %v1419_v47  ;;  %v1426_v59 = vshrl.u32 %v2725_v52, %v3616_v15  ;;  %v1429_v53 = vshrl.u32 %v2726_v55, %v3616_v15 }
 0x190   : > { %v1229_v12 = vadd.f32 -0.4999988, %v1228_v41  ;;  %v1236_v43 = vadd.f32 -0.16666654, %v1235_v63  ;;  %v1356_v16 = vsel %vm1354_vm6, %v1355_v9, %v1353_v32  ;;  %v1432_v60 = vshrl.u32 %v2727_v58, %v3616_v15 }
 0x191   : > { %v1357_v19 = vclz %v1356_v16  ;;  %v3631_v5 = vor.u32 %v1423_v20, %v1422_v62  ;;  %v3633_v14 = vor.u32 %v1426_v59, %v1425_v29  ;;  %v1430_v52 = vor.u32 %v1429_v53, %v1428_v36 }
 0x192   : > { %v1230_v38 = vmul.f32 %v1229_v12, %v1225_v17  ;;  %v1237_v56 = vmul.f32 %v1236_v43, %v1225_v17  ;;  %v1434_v55 = vshll.u32 %v2727_v58, %v1419_v47  ;;  %v1435_v6 = vshrl.u32 %v2728_v61, %v3616_v15 }
 0x193   : > { %v2489_v11 = vadd.s32 4294967294, %v1357_v19  ;;  %vm1437_vm13 = vcmp.lt.s32.totalorder %v3614_v8, 1  ;;  %vm1440_vm14 = vcmp.lt.s32.totalorder %v3614_v8, 4  ;;  %vm1439_vm15 = vcmp.lt.s32.totalorder %v3614_v8, 3 }
 0x194   : > { %v1231_v39 = vadd.f32 1.0, %v1230_v38  ;;  %v1238_v34 = vadd.f32 1.0, %v1237_v56  ;;  %v1436_v3 = vor.u32 %v1435_v6, %v1434_v55  ;;  %v1445_v58 = vsel %vm1437_vm13, %v3631_v5, %v3633_v14 }
 0x195   : > { %vm2490_vm12 = vcmp.lt.s32.totalorder %v2489_v11, 0  ;;  %vm1438_vm2 = vcmp.lt.s32.totalorder %v3614_v8, 2  ;;  %v1449_v41 = vsel %vm1437_vm13, %v3633_v14, %v1430_v52  ;;  %v1454_v43 = vand.u32 65535, %v3651_v22 }
 0x196   : > { %v1239_v2 = vmul.f32 %v1238_v34, %v1223_v21  ;;  %v1247_v18 = vxor.u32 2147483648, %v1231_v39  ;;  %v1360_v40 = vsel %vm2490_vm12, 0, %v2489_v11  ;;  %v1433_v21 = vor.u32 %v1432_v60, %v1431_v4 }
 0x197   : > { %v1361_v26 = vsub.s32 32, %v1360_v40  ;;  %v1362_v48 = vshll.u32 %v1353_v32, %v1360_v40  ;;  %v1365_v27 = vsub.s32 4294967266, %v1360_v40  ;;  %v1450_v63 = vsel %vm1440_vm14, %v1436_v3, 1326507024 }
 0x198   : > { %v1244_v24 = vxor.u32 2147483648, %v1239_v2  ;;  %v1248_v0 = vsel %vm1246_vm10, %v1247_v18, %v1239_v2  ;;  %v1446_v61 = vsel %vm1440_vm14, %v1433_v21, 920167782  ;;  %v1451_v54 = vsel %vm1439_vm15, %v1433_v21, %v1450_v63 }
 0x199   : > { %v1363_v17 = vshrl.u32 %v1345_v49, %v1361_v26  ;;  %v1366_v33 = vadd.s32 127, %v1365_v27  ;;  %v1447_v37 = vsel %vm1439_vm15, %v1430_v52, %v1446_v61  ;;  %v1452_v12 = vsel %vm1438_vm2, %v1449_v41, %v1451_v54 }
 0x19a   : > { %v1245_v25 = vsel %vm1243_vm8, %v1231_v39, %v1244_v24  ;;  %v1448_v28 = vsel %vm1438_vm2, %v1445_v58, %v1447_v37  ;;  %v1455_v38 = vshrl.u32 %v3651_v22, 16  ;;  %v1456_v56 = vand.u32 65535, %v1452_v12 }
 0x19b   : > { %v1249_v31 = vsel %vm1242_vm7, %v1245_v25, %v1248_v0  ;;  %v1364_v50 = vor.u32 %v1363_v17, %v1362_v48  ;;  %v1367_v57 = vshll.u32 %v1366_v33, 23  ;;  %v1479_v51 = vshrl.u32 %v1448_v28, 16 }
 0x19c   : > { %v1250_v10 = vsel %vm1240_vm9, nan, %v1249_v31  ;;  %v1478_v9 = vand.u32 65535, %v1448_v28  ;;  %v1457_v16 = vshrl.u32 %v1452_v12, 16  ;;  %v1375_v39 = vsub.s32 4, %v3605_v30 }
 0x19d   : > { %1752 = vmatpush.msrb.mxu1 %v1250_v10  ;;  %v1368_v35 = vor.u32 4788187, %v1367_v57  ;;  %v1371_v32 = vcvt.s32.f32 %v1364_v50  ;;  %v1481_v19 = vmul.u32 %v1479_v51, %v1454_v43  ;;  %v1460_v11 = vmul.u32 %v1456_v56, %v1455_v38 }
 0x19e   : > { %v1459_v34 = vmul.u32 %v1457_v16, %v1454_v43  ;;  %v1442_v62 = vsel %vm1440_vm14, %v1430_v52, 2102212464  ;;  %v1480_v29 = vmul.u32 %v1478_v9, %v1454_v43  ;;  %v1482_v36 = vmul.u32 %v1478_v9, %v1455_v38 }
 0x19f   : > { %v1369_v44 = vand.u32 2147483647, %v1368_v35  ;;  %v1484_v2 = vshll.u32 %v1481_v19, 16  ;;  %v1458_v18 = vmul.u32 %v1456_v56, %v1454_v43  ;;  %v1483_v4 = vmul.u32 %v1479_v51, %v1455_v38 }
 0x1a0   : > { %v1462_v20 = vshll.u32 %v1459_v34, 16  ;;  %v1461_v53 = vmul.u32 %v1457_v16, %v1455_v38  ;;  %v1464_v60 = vshll.u32 %v1460_v11, 16  ;;  %v1486_v48 = vshll.u32 %v1482_v36, 16 }
 0x1a1   : > { %v1372_v47 = vmul.f32 %v1371_v32, %v1369_v44  ;;  %vm1488_vm1 = vc.u32 %v1480_v29, %v1484_v2  ;;  %v1490_v27 = vadd.s32 %v1484_v2, %v1480_v29  ;;  %v1421_v31 = vshrl.u32 %v2723_v46, %v3616_v15 }
 0x1a2   : > { %vm1466_vm4 = vc.u32 %v1458_v18, %v1462_v20  ;;  %v1468_v0 = vadd.s32 %v1462_v20, %v1458_v18  ;;  %v1489_v40 = vsel %vm1488_vm1, 1, %v2721_v1  ;;  %v1463_v17 = vshrl.u32 %v1459_v34, 16 }
 0x1a3   : > { %v1373_v42 = vxor.u32 2147483648, %v1372_v47  ;;  %v1467_v26 = vsel %vm1466_vm4, 1, %v2721_v1  ;;  %v1491_v25 = vadd.s32 %v1489_v40, %v1483_v4  ;;  %vm1492_vm6 = vc.u32 %v1490_v27, %v1486_v48 }
 0x1a4   : > { %v1469_v55 = vadd.s32 %v1467_v26, %v1461_v53  ;;  %vm1470_vm5 = vc.u32 %v1468_v0, %v1464_v60  ;;  %v1493_v57 = vsel %vm1492_vm6, 1, %v2721_v1  ;;  %v1441_v3 = vsel %vm1437_vm13, %v1421_v31, %v3631_v5 }
 0x1a5   : > { %v1374_v7 = vsel %vm1253_vm0, %v1373_v42, %v1372_v47  ;;  %v1471_v33 = vsel %vm1470_vm5, 1, %v2721_v1  ;;  %v1443_v58 = vsel %vm1439_vm15, %v3633_v14, %v1442_v62  ;;  %v1485_v61 = vshrl.u32 %v1481_v19, 16 }
 0x1a6   : > { %v1377_v59 = vsel %vm3671_vm3, %v3347_v13, %v1374_v7  ;;  %v1473_v50 = vadd.s32 %v1471_v33, %v1469_v55  ;;  %v1495_v35 = vadd.s32 %v1493_v57, %v1491_v25  ;;  %v1465_v37 = vshrl.u32 %v1460_v11, 16  ;;  %v1560_v33 = vld [vmem:[%s4078_s2 + $0x8] sm:$0xff] }
 0x1a7   : > { %v1379_v24 = vmul.f32 %v1377_v59, %v1377_v59  ;;  %v1376_v41 = vsel %vm1253_vm0, %v1375_v39, %v3605_v30  ;;  %v1487_v63 = vshrl.u32 %v1482_v36, 16  ;;  %v1494_v5 = vadd.s32 %v1490_v27, %v1486_v48  ;;  %2495 = vmatmul.msk.f32.gmra.mxu0 %vm1563_vm11, %v1560_v33  ;;  %2499 = vmatmul.msk.f32.gmra.mxu1 %vm1563_vm11, %v1560_v33 }
 0x1a8   : > { %v1474_v28 = vadd.s32 %v1473_v50, %v1463_v17  ;;  %v1496_v1 = vadd.s32 %v1495_v35, %v1485_v61  ;;  %v1444_v51 = vsel %vm1438_vm2, %v1441_v3, %v1443_v58  ;;  %v1378_v12 = vsel %vm3671_vm3, 0, %v1376_v41  ;;  %2503 = vmatmul.msk.f32.gmra.mxu2 %vm1563_vm11, %v1560_v33  ;;  %2507 = vmatmul.msk.f32.gmra.mxu3 %vm1563_vm11, %v1560_v33  ;;  %v2643_v33 = vld [vmem:[%s3909_s9 + $0x10] sm:$0xff] }
 0x1a9   : > { %v1380_v52 = vmul.f32 -0.001358992, %v1379_v24  ;;  %v1387_v21 = vmul.f32 -0.00019511016, %v1379_v24  ;;  %v1498_v30 = vmul.u32 %v3651_v22, %v1444_v51  ;;  %v1395_v16 = vand.u32 3, %v1378_v12 }
 0x1aa   : > { %v1475_v54 = vadd.s32 %v1474_v28, %v1465_v37  ;;  %v1497_v14 = vadd.s32 %v1496_v1, %v1487_v63  ;;  %vm1394_vm12 = vweird.f32 %v3347_v13  ;;  %v2695_v13 = vld [vmem:[%s4076_s0 + $0x8] sm:$0x77]  ;;  %v1852_v50 = vlaneseq  ;;  %v1561_v1 = vld [vmem:[%s4078_s2 + $0x10] sm:$0xff] }
 0x1ab   : > { %v1381_v6 = vadd.f32 0.041655596, %v1380_v52  ;;  %v1388_v10 = vadd.f32 0.008332121, %v1387_v21  ;;  %vm1397_vm8 = vcmp.eq.s32.totalorder %v1395_v16, 0  ;;  %vm1400_vm9 = vcmp.eq.s32.totalorder %v1395_v16, 2 }
 0x1ac   : > { %vm1500_vm7 = vc.u32 %v1475_v54, %v1494_v5  ;;  %v1501_v47 = vadd.s32 1, %v1497_v14  ;;  %vm1396_vm10 = vcmp.lt.s32.totalorder %v1395_v16, 2  ;;  %v1499_v60 = vadd.s32 %v1494_v5, %v1475_v54  ;;  %v2696_v52 = vld [vmem:[%s4076_s0] sm:$0x77] }
 0x1ad   : > { %v1382_v46 = vmul.f32 %v1381_v6, %v1379_v24  ;;  %v1389_v15 = vmul.f32 %v1388_v10, %v1379_v24  ;;  %v2654_v40 = vceil.f32 %v2695_v13  ;;  %v2655_v26 = vfloor.f32 %v2695_v13 }
 0x1ae   : > { %v1502_v19 = vsel %vm1500_vm7, %v1501_v47, %v1497_v14  ;;  %v2649_v21 = vceil.f32 %v2696_v52  ;;  %v2650_v55 = vfloor.f32 %v2696_v52  ;;  %vm2653_vm15 = vcmp.lt.s32.totalorder %v2695_v13, 0 }
 0x1af   : > { %v1383_v44 = vadd.f32 -0.4999988, %v1382_v46  ;;  %v1390_v32 = vadd.f32 -0.16666654, %v1389_v15  ;;  %v1503_v34 = vadd.s32 %v1502_v19, %v1498_v30  ;;  %vm2648_vm2 = vcmp.lt.s32.totalorder %v2696_v52, 0  ;;  %2496 = vmatmul.msk.f32.gmra.mxu0 %vm1563_vm11, %v1561_v1  ;;  %2500 = vmatmul.msk.f32.gmra.mxu1 %vm1563_vm11, %v1561_v1  ;;  %v1562_v19 = vld [vmem:[%s4078_s2 + $0x18] sm:$0xff] }
 0x1b0   : > { %v3719_v10 = vsel %vm2653_vm15, %v2654_v40, %v2655_v26  ;;  %v2651_v3 = vsel %vm2648_vm2, %v2649_v21, %v2650_v55  ;;  %v3724_v35 = vshrl.u32 %v1852_v50, 7  ;;  %vm1407_vm3 = vcmp.lt.s32.totalorder %v3589_v23, 0  ;;  %2504 = vmatmul.msk.f32.gmra.mxu2 %vm1563_vm11, %v1561_v1  ;;  %2508 = vmatmul.msk.f32.gmra.mxu3 %vm1563_vm11, %v1561_v1  ;;  %v1693_v52 = vld [vmem:[%s4079_s3 + $0x8] sm:$0xff]  ;;  %v1695_v55 = vld [vmem:[%s4079_s3 + $0x18] sm:$0xff]  ;;  %v1622_v50 = vpop.f32.mrf.mxu1 }
 0x1b1   : > { %v1384_v43 = vmul.f32 %v1383_v44, %v1379_v24  ;;  %v1391_v9 = vmul.f32 %v1390_v32, %v1379_v24  ;;  %v1504_v8 = vadd.s32 536870912, %v1503_v34  ;;  %v2657_v57 = vcvt.f32.s32 %v3719_v10  ;;  %v1593_v10 = vpop.f32.mrf.mxu0 }
 0x1b2   : > { %v2652_v46 = vcvt.f32.s32 %v2651_v3  ;;  %v3729_v28 = vadd.s32 48, %v3724_v35  ;;  %v3732_v41 = vadd.s32 56, %v3724_v35  ;;  %vm3744_vm0 = vcmp.le.f32.partialorder %v1405_v45, 0.7853982 }
 0x1b3   : > { %v1385_v38 = vadd.f32 1.0, %v1384_v43  ;;  %v1392_v56 = vadd.f32 1.0, %v1391_v9  ;;  %v3704_v29 = vshrl.u32 %v1504_v8, 30  ;;  %v1863_v15 = vperm.slane %v2657_v57, 2 }
 0x1b4   : > { %v1862_v63 = vperm.slane %v2652_v46, 6  ;;  %v1861_v45 = vperm.slane %v2652_v46, 2  ;;  %v3766_v12 = vadd.s32 32, %v3724_v35  ;;  %v3769_v43 = vadd.s32 40, %v3724_v35 }
 0x1b5   : > { %v1393_v42 = vmul.f32 %v1392_v56, %v1377_v59  ;;  %v1401_v39 = vxor.u32 2147483648, %v1385_v38  ;;  %v1506_v22 = vshll.u32 %v3704_v29, 30  ;;  %v3737_v44 = vperm.slane %v1863_v15, 2 }
 0x1b6   : > { %v3740_v54 = vperm.slane %v1862_v63, 2  ;;  %v2729_v47 = vmov 1.0|1.0   ;;  %v1529_v56 = vsub.s32 4, %v3704_v29  ;;  %v1854_v13 = vadd.s32 8, %v3724_v35 }
 0x1b7   : > { %v1398_v11 = vxor.u32 2147483648, %v1393_v42  ;;  %v1402_v62 = vsel %vm1400_vm9, %v1401_v39, %v1393_v42  ;;  %v1507_v7 = vsub.s32 %v1503_v34, %v1506_v22  ;;  %vm1895_vm1 = vcmp.eq.s32.totalorder %v3729_v28, %v3737_v44  ;;  %2497 = vmatmul.msk.f32.gmra.mxu0 %vm1563_vm11, %v1562_v19  ;;  %2501 = vmatmul.msk.f32.gmra.mxu1 %vm1563_vm11, %v1562_v19  ;;  %v1651_v3 = vpop.f32.mrf.mxu2 }
 0x1b8   : > { %vm1899_vm4 = vcmp.eq.s32.totalorder %v3732_v41, %v3737_v44  ;;  %vm1894_vm5 = vcmp.eq.s32.totalorder %v3729_v28, %v3740_v54  ;;  %vm1898_vm6 = vcmp.eq.s32.totalorder %v3732_v41, %v3740_v54  ;;  %vm1887_vm9 = vcmp.eq.s32.totalorder %v3766_v12, %v3737_v44  ;;  %2505 = vmatmul.msk.f32.gmra.mxu2 %vm1563_vm11, %v1562_v19 }
 0x1b9   : > { %v1399_v49 = vsel %vm1397_vm8, %v1385_v38, %v1398_v11  ;;  %vm1508_vm13 = vcmp.lt.s32.totalorder %v1507_v7, 0  ;;  %v1509_v18 = vsub.s32 0, %v1507_v7  ;;  %vm2610_vm7 = vmpackc.low %vm1899_vm4, %vm1895_vm1  ;;  %v3772_v38 = vperm.slane %v1861_v45, 2  ;;  %2509 = vmatmul.msk.f32.gmra.mxu3 %vm1563_vm11, %v1562_v19 }
 0x1ba   : > { %v1403_v36 = vsel %vm1396_vm10, %v1399_v49, %v1402_v62  ;;  %vm2596_vm8 = vmpackc.low %vm1898_vm6, %vm1894_vm5  ;;  %vm1891_vm10 = vcmp.eq.s32.totalorder %v3769_v43, %v3737_v44  ;;  %vm1886_vm15 = vcmp.eq.s32.totalorder %v3766_v12, %v3740_v54  ;;  %vm1890_vm2 = vcmp.eq.s32.totalorder %v3769_v43, %v3740_v54 }
 0x1bb   : > { %v1404_v2 = vsel %vm1394_vm12, nan, %v1403_v36  ;;  %v1510_v20 = vsel %vm1508_vm13, %v1509_v18, %v1507_v7  ;;  %2597 = vmatpush.bf16.msk.msra.mxu1 %vm2596_vm8, %v2729_v47  ;;  %vm1893_vm12 = vcmp.eq.s32.totalorder %v3729_v28, %v3772_v38  ;;  %vm1897_vm13 = vcmp.eq.s32.totalorder %v3732_v41, %v3772_v38  ;;  %vm2612_vm1 = vmpackc.low %vm1891_vm10, %vm1887_vm9 }
 0x1bc   : > { %1781 = vmatpush.msrb.mxu2 %v1404_v2  ;;  %v1511_v4 = vclz %v1510_v20  ;;  %v1530_v34 = vsel %vm1407_vm3, %v1529_v56, %v3704_v29  ;;  %vm2598_vm4 = vmpackc.low %vm1890_vm2, %vm1886_vm15  ;;  %vm1885_vm5 = vcmp.eq.s32.totalorder %v3766_v12, %v3772_v38  ;;  %v3801_v49 = vadd.s32 16, %v3724_v35  ;;  %v1692_v20 = vld [vmem:[%s4079_s3] sm:$0xff] }
 0x1bd   : > { %v1864_v62 = vperm.slane %v2657_v57, 6  ;;  %v3810_v29 = vadd.s32 24, %v3724_v35  ;;  %v1532_v22 = vsel %vm3744_vm0, 0, %v1530_v34  ;;  %v2645_v57 = vld [vmem:[%s3909_s9 + $0x20] sm:$0xff] }
 0x1be   : > { %v2492_v59 = vadd.s32 4294967294, %v1511_v4  ;;  %2611 = vmatpush.bf16.msk.msra.mxu2 %vm2610_vm7, %v2729_v47  ;;  %vm1879_vm7 = vcmp.eq.s32.totalorder %v3801_v49, %v3737_v44  ;;  %vm1878_vm9 = vcmp.eq.s32.totalorder %v3801_v49, %v3740_v54 }
 0x1bf   : > { %2599 = vmatpush.bf16.msk.msra.mxu1 %vm2598_vm4, %v2729_v47  ;;  %vm1883_vm8 = vcmp.eq.s32.totalorder %v3810_v29, %v3737_v44  ;;  %vm1882_vm10 = vcmp.eq.s32.totalorder %v3810_v29, %v3740_v54  ;;  %v3827_v4 = vperm.slane %v1864_v62, 2  ;;  %2510 = vmatmul.msk.f32.vlgmr.msrb.gmra.mxu0 %vm1563_vm11, %v1692_v20 }
 0x1c0   : > { %vm2493_vm14 = vcmp.lt.s32.totalorder %v2492_v59, 0  ;;  %2514 = vmatmul.msk.f32.vlgmr.msrb.gmra.mxu1 %vm1563_vm11, %v1692_v20  ;;  %2518 = vmatmul.msk.f32.vlgmr.msrb.gmra.mxu2 %vm1563_vm11, %v1692_v20 }
 0x1c1   : > { %v1514_v53 = vsel %vm2493_vm14, 0, %v2492_v59  ;;  %vm2582_vm14 = vmpackc.low %vm1897_vm13, %vm1893_vm12  ;;  %vm1877_vm13 = vcmp.eq.s32.totalorder %v3801_v49, %v3772_v38  ;;  %vm1896_vm15 = vcmp.eq.s32.totalorder %v3729_v28, %v3827_v4  ;;  %vm1900_vm2 = vcmp.eq.s32.totalorder %v3732_v41, %v3827_v4  ;;  %v2646_v28 = vld [vmem:[%s3909_s9 + $0x28] sm:$0xff] }
 0x1c2   : > { %v1515_v24 = vsub.s32 32, %v1514_v53  ;;  %v1519_v0 = vsub.s32 4294967266, %v1514_v53  ;;  %v1516_v48 = vshll.u32 %v1507_v7, %v1514_v53  ;;  %2583 = vmatpush.bf16.msk.msra.mxu0 %vm2582_vm14, %v2729_v47  ;;  %2613 = vmatpush.bf16.msk.msra.mxu2 %vm2612_vm1, %v2729_v47  ;;  %vm2600_vm12 = vmpackc.low %vm1882_vm10, %vm1878_vm9  ;;  %vm1881_vm14 = vcmp.eq.s32.totalorder %v3810_v29, %v3772_v38 }
 0x1c3   : > { %2601 = vmatpush.bf16.msk.msra.mxu1 %vm2600_vm12, %v2729_v47  ;;  %vm2586_vm1 = vmpackc.low %vm1881_vm14, %vm1877_vm13  ;;  %vm1873_vm9 = vcmp.eq.s32.totalorder %v1854_v13, %v3772_v38  ;;  %vm1874_vm12 = vcmp.eq.s32.totalorder %v1854_v13, %v3740_v54  ;;  %vm1548_vm13 = vweird.f32 %v3589_v23 }
 0x1c4   : > { %v1517_v27 = vshrl.u32 %v1499_v60, %v1515_v24  ;;  %v1520_v25 = vadd.s32 127, %v1519_v0  ;;  %v1549_v60 = vand.u32 3, %v1532_v22  ;;  %vm3853_vm10 = vmpackc.low %vm1900_vm2, %vm1896_vm15  ;;  %vm1888_vm2 = vcmp.eq.s32.totalorder %v3766_v12, %v3827_v4 }
 0x1c6   : > { %v1518_v31 = vor.u32 %v1517_v27, %v1516_v48  ;;  %v1521_v17 = vshll.u32 %v1520_v25, 23  ;;  %vm1550_vm4 = vcmp.lt.s32.totalorder %v1549_v60, 2 }
 0x1c7   : > { %2511 = vmatmul.msk.f32.gmra.mxu0 %vm1563_vm11, %v1693_v52 }
 0x1c8   : > { %v1522_v6 = vor.u32 4788187, %v1521_v17  ;;  %v1525_v61 = vcvt.s32.f32 %v1518_v31  ;;  %2515 = vmatmul.msk.f32.gmra.mxu1 %vm1563_vm11, %v1693_v52  ;;  %2519 = vmatmul.msk.f32.gmra.mxu2 %vm1563_vm11, %v1693_v52  ;;  %v2641_v31 = vld [vmem:[%s3909_s9] sm:$0xff]  ;;  %v2642_v17 = vld [vmem:[%s3909_s9 + $0x8] sm:$0xff] }
 0x1ca   : > { %v1523_v58 = vand.u32 2147483647, %v1522_v6  ;;  %v2644_v6 = vld [vmem:[%s3909_s9 + $0x18] sm:$0xff] }
 0x1cc   : > { %v1526_v37 = vmul.f32 %v1525_v61, %v1523_v58 }
 0x1ce   : > { %v1527_v32 = vxor.u32 2147483648, %v1526_v37 }
 0x1d0   : > { %v1528_v51 = vsel %vm1407_vm3, %v1527_v32, %v1526_v37  ;;  %vm1889_vm3 = vcmp.eq.s32.totalorder %v3769_v43, %v3772_v38 }
 0x1d1   : > { %v1531_v14 = vsel %vm3744_vm0, %v3589_v23, %v1528_v51  ;;  %vm2584_vm6 = vmpackc.low %vm1889_vm3, %vm1885_vm5  ;;  %vm1551_vm5 = vcmp.eq.s32.totalorder %v1549_v60, 0  ;;  %vm1871_vm3 = vcmp.eq.s32.totalorder %v3724_v35, %v3737_v44  ;;  %v1694_v23 = vld [vmem:[%s4079_s3 + $0x10] sm:$0xff] }
 0x1d2   : > { %v1533_v9 = vmul.f32 %v1531_v14, %v1531_v14  ;;  %2585 = vmatpush.bf16.msk.msra.mxu0 %vm2584_vm6, %v2729_v47  ;;  %vm2614_vm0 = vmpackc.low %vm1883_vm8, %vm1879_vm7  ;;  %vm1554_vm6 = vcmp.eq.s32.totalorder %v1549_v60, 2  ;;  %vm1875_vm7 = vcmp.eq.s32.totalorder %v1854_v13, %v3737_v44  ;;  %vm1869_vm8 = vcmp.eq.s32.totalorder %v3724_v35, %v3772_v38  ;;  %2516 = vmatmul.msk.f32.gmra.mxu1 %vm1563_vm11, %v1694_v23 }
 0x1d3   : > { %2615 = vmatpush.bf16.msk.msra.mxu2 %vm2614_vm0, %v2729_v47  ;;  %vm1870_vm0 = vcmp.eq.s32.totalorder %v3724_v35, %v3740_v54  ;;  %vm2616_vm14 = vmpackc.low %vm1875_vm7, %vm1871_vm3  ;;  %vm1880_vm3 = vcmp.eq.s32.totalorder %v3801_v49, %v3827_v4  ;;  %2512 = vmatmul.msk.f32.gmra.mxu0 %vm1563_vm11, %v1694_v23 }
 0x1d4   : > { %v1534_v30 = vmul.f32 -0.001358992, %v1533_v9  ;;  %v1541_v16 = vmul.f32 -0.00019511016, %v1533_v9  ;;  %vm2588_vm15 = vmpackc.low %vm1873_vm9, %vm1869_vm8  ;;  %vm1872_vm8 = vcmp.eq.s32.totalorder %v3724_v35, %v3827_v4  ;;  %vm1876_vm9 = vcmp.eq.s32.totalorder %v1854_v13, %v3827_v4  ;;  %2520 = vmatmul.msk.f32.gmra.mxu2 %vm1563_vm11, %v1694_v23 }
 0x1d6   : > { %v1535_v42 = vadd.f32 0.041655596, %v1534_v30  ;;  %v1542_v39 = vadd.f32 0.008332121, %v1541_v16  ;;  %2587 = vmatpush.bf16.msk.msra.mxu0 %vm2586_vm1, %v2729_v47  ;;  %vm1892_vm1 = vcmp.eq.s32.totalorder %v3769_v43, %v3827_v4 }
 0x1d7   : > { %2617 = vmatpush.bf16.msk.msra.mxu2 %vm2616_vm14, %v2729_v47 }
 0x1d8   : > { %v1536_v11 = vmul.f32 %v1535_v42, %v1533_v9  ;;  %v1543_v8 = vmul.f32 %v1542_v39, %v1533_v9  ;;  %v1680_v58 = vpop.f32.mrf.mxu3 }
 0x1da   : > { %v1537_v36 = vadd.f32 -0.4999988, %v1536_v11  ;;  %v1544_v2 = vadd.f32 -0.16666654, %v1543_v8  ;;  %2589 = vmatpush.bf16.msk.msra.mxu0 %vm2588_vm15, %v2729_v47  ;;  %2517 = vmatmul.msk.f32.gmra.mxu1 %vm1563_vm11, %v1695_v55 }
 0x1db   : > { %2513 = vmatmul.msk.f32.gmra.mxu0 %vm1563_vm11, %v1695_v55 }
 0x1dc   : > { %v1538_v7 = vmul.f32 %v1537_v36, %v1533_v9  ;;  %v1545_v18 = vmul.f32 %v1544_v2, %v1533_v9  ;;  %2521 = vmatmul.msk.f32.gmra.mxu2 %vm1563_vm11, %v1695_v55 }
 0x1de   : > { %v1539_v59 = vadd.f32 1.0, %v1538_v7  ;;  %v1546_v53 = vadd.f32 1.0, %v1545_v18 }
 0x1e0   : > { %v1547_v24 = vmul.f32 %v1546_v53, %v1531_v14  ;;  %v1555_v0 = vxor.u32 2147483648, %v1539_v59 }
 0x1e2   : > { %v1552_v40 = vxor.u32 2147483648, %v1547_v24  ;;  %v1556_v48 = vsel %vm1554_vm6, %v1555_v0, %v1547_v24  ;;  %vm1884_vm6 = vcmp.eq.s32.totalorder %v3810_v29, %v3827_v4 }
 0x1e3   : > { %vm2628_vm7 = vmpackc.low %vm1884_vm6, %vm1880_vm3 }
 0x1e4   : > { %v1553_v26 = vsel %vm1551_vm5, %v1539_v59, %v1552_v40  ;;  %vm2626_vm5 = vmpackc.low %vm1892_vm1, %vm1888_vm2 }
 0x1e5   : > { %v1557_v25 = vsel %vm1550_vm4, %v1553_v26, %v1556_v48  ;;  %vm2602_vm4 = vmpackc.low %vm1874_vm12, %vm1870_vm0  ;;  %vm2011_vm0 = vcmask 523264   ;;  %vm2343_vm12 = vcmp.eq.s32.totalorder %v3724_v35, 1 }
 0x1e6   : > { %v1558_v21 = vsel %vm1548_vm13, nan, %v1557_v25  ;;  %2603 = vmatpush.bf16.msk.msra.mxu1 %vm2602_vm4, %v2729_v47  ;;  %2590 = vmatmul.msk.bf16.vlgmr.msra.gmra.mxu0 %vm2011_vm0, %v2641_v31  ;;  %vm2358_vm13 = vcmask 1043456  }
 0x1e7   : > { %1810 = vmatpush.msrb.mxu3 %v1558_v21  ;;  %2618 = vmatmul.msk.bf16.vlgmr.msra.gmra.mxu2 %vm2011_vm0, %v2641_v31 }
 0x1e8   : > { %2522 = vmatmul.msk.f32.vlgmr.msrb.gmra.mxu3 %vm1563_vm11, %v1692_v20 }
 0x1e9   : > { %2625 = vmatpush.bf16.msk.msra.mxu3 %vm3853_vm10, %v2729_v47  ;;  %vm2630_vm10 = vmpackc.low %vm1876_vm9, %vm1872_vm8  ;;  %2604 = vmatmul.msk.bf16.vlgmr.msra.gmra.mxu1 %vm2011_vm0, %v2641_v31 }
 0x1ed   : > { %2627 = vmatpush.bf16.msk.msra.mxu3 %vm2626_vm5, %v2729_v47 }
 0x1f0   : > { %2523 = vmatmul.msk.f32.gmra.mxu3 %vm1563_vm11, %v1693_v52 }
 0x1f1   : > { %2629 = vmatpush.bf16.msk.msra.mxu3 %vm2628_vm7, %v2729_v47 }
 0x1f5   : > { %2631 = vmatpush.bf16.msk.msra.mxu3 %vm2630_vm10, %v2729_v47 }
 0x1f6   : > { %2591 = vmatmul.msk.bf16.gmra.mxu0 %vm2011_vm0, %v2642_v17 }
 0x1f7   : > { %2619 = vmatmul.msk.bf16.gmra.mxu2 %vm2011_vm0, %v2642_v17 }
 0x1f8   : > { %2524 = vmatmul.msk.f32.gmra.mxu3 %vm1563_vm11, %v1694_v23 }
 0x1f9   : > { %2605 = vmatmul.msk.bf16.gmra.mxu1 %vm2011_vm0, %v2642_v17 }
 0x200   : > { %2525 = vmatmul.msk.f32.gmra.mxu3 %vm1563_vm11, %v1695_v55  ;;  %vm2342_vm11 = vcmp.eq.s32.totalorder %v3724_v35, 0 }
 0x206   : > { %2592 = vmatmul.msk.bf16.gmra.mxu0 %vm2011_vm0, %v2643_v33 }
 0x207   : > { %2620 = vmatmul.msk.bf16.gmra.mxu2 %vm2011_vm0, %v2643_v33 }
 0x208   : > { %2632 = vmatmul.msk.bf16.vlgmr.msra.gmra.mxu3 %vm2011_vm0, %v2641_v31 }
 0x209   : > { %2606 = vmatmul.msk.bf16.gmra.mxu1 %vm2011_vm0, %v2643_v33 }
 0x216   : > { %2593 = vmatmul.msk.bf16.gmra.mxu0 %vm2011_vm0, %v2644_v6 }
 0x217   : > { %2621 = vmatmul.msk.bf16.gmra.mxu2 %vm2011_vm0, %v2644_v6 }
 0x218   : > { %2633 = vmatmul.msk.bf16.gmra.mxu3 %vm2011_vm0, %v2642_v17 }
 0x219   : > { %2607 = vmatmul.msk.bf16.gmra.mxu1 %vm2011_vm0, %v2644_v6 }
 0x224   : > { %v1596_v61 = vpop.f32.mrf.mxu0  ;;  %v1625_v46 = vpop.f32.mrf.mxu1 }
 0x226   : > { %2594 = vmatmul.msk.bf16.gmra.mxu0 %vm2011_vm0, %v2645_v57 }
 0x227   : > { %2622 = vmatmul.msk.bf16.gmra.mxu2 %vm2011_vm0, %v2645_v57 }
 0x228   : > { %2634 = vmatmul.msk.bf16.gmra.mxu3 %vm2011_vm0, %v2643_v33 }
 0x229   : > { %2608 = vmatmul.msk.bf16.gmra.mxu1 %vm2011_vm0, %v2645_v57 }
 0x22b   : > { %v1654_v15 = vpop.f32.mrf.mxu2  ;;  %v1683_v37 = vpop.f32.mrf.mxu3 }
 0x22c   : > { %v1599_v41 = vpop.f32.mrf.mxu0  ;;  %v1628_v63 = vpop.f32.mrf.mxu1 }
 0x233   : > { %v1657_v1 = vpop.f32.mrf.mxu2  ;;  %v1686_v54 = vpop.f32.mrf.mxu3 }
 0x234   : > { %v1602_v44 = vpop.f32.mrf.mxu0  ;;  %v1631_v32 = vpop.f32.mrf.mxu1 }
 0x236   : > { %2595 = vmatmul.msk.bf16.gmra.mxu0 %vm2011_vm0, %v2646_v28 }
 0x237   : > { %2623 = vmatmul.msk.bf16.gmra.mxu2 %vm2011_vm0, %v2646_v28 }
 0x238   : > { %2635 = vmatmul.msk.bf16.gmra.mxu3 %vm2011_vm0, %v2644_v6 }
 0x239   : > { %2609 = vmatmul.msk.bf16.gmra.mxu1 %vm2011_vm0, %v2646_v28 }
 0x23b   : > { %v1660_v5 = vpop.f32.mrf.mxu2 }
 0x23c   : > { %v1725_v51 = vpop.f32.mrf.mxu0  ;;  %v1689_v43 = vpop.f32.mrf.mxu3 }
 0x23d   : > { %v1754_v45 = vpop.f32.mrf.mxu1  ;;  %v3943_v14 = vmul.f32 %v1725_v51, %v1593_v10 }
 0x23e   : > { %v3945_v12 = vmul.f32 %v1754_v45, %v1622_v50 }
 0x243   : > { %v1783_v9 = vpop.f32.mrf.mxu2 }
 0x244   : > { %v3947_v47 = vmul.f32 %v1783_v9, %v1651_v3  ;;  %v1728_v38 = vpop.f32.mrf.mxu0 }
 0x245   : > { %v3949_v56 = vmul.f32 %v1728_v38, %v1596_v61  ;;  %v1757_v30 = vpop.f32.mrf.mxu1 }
 0x246   : > { %v3951_v16 = vmul.f32 %v1757_v30, %v1625_v46 }
 0x248   : > { %2636 = vmatmul.msk.bf16.gmra.mxu3 %vm2011_vm0, %v2645_v57 }
 0x24b   : > { %v1786_v39 = vpop.f32.mrf.mxu2 }
 0x24c   : > { %v3955_v11 = vmul.f32 %v1786_v39, %v1654_v15 }
 0x24f   : > { %v1760_v49 = vpop.f32.mrf.mxu1 }
 0x250   : > { %v1731_v34 = vpop.f32.mrf.mxu0  ;;  %v3959_v62 = vmul.f32 %v1760_v49, %v1628_v63 }
 0x251   : > { %v3957_v8 = vmul.f32 %v1731_v34, %v1599_v41 }
 0x257   : > { %v1789_v2 = vpop.f32.mrf.mxu2  ;;  %v1763_v20 = vpop.f32.mrf.mxu1 }
 0x258   : > { %2637 = vmatmul.msk.bf16.gmra.mxu3 %vm2011_vm0, %v2646_v28  ;;  %v1734_v22 = vpop.f32.mrf.mxu0  ;;  %v3963_v7 = vmul.f32 %v1789_v2, %v1657_v1  ;;  %v3967_v4 = vmul.f32 %v1763_v20, %v1631_v32 }
 0x259   : > { %v3965_v18 = vmul.f32 %v1734_v22, %v1602_v44 }
 0x25f   : > { %v1792_v60 = vpop.f32.mrf.mxu2 }
 0x260   : > { %v3971_v0 = vmul.f32 %v1792_v60, %v1660_v5 }
 0x263   : > { %v2039_v24 = vpop.f32.mrf.mxu0 }
 0x264   : > { %v2186_v13 = vmul.f32 %v2039_v24, %v3943_v14 }
 0x266   : > { %v2078_v40 = vpop.f32.mrf.mxu1 }
 0x267   : > { %v2187_v26 = vmul.f32 %v2078_v40, %v3945_v12 }
 0x26a   : > { %v2117_v25 = vpop.f32.mrf.mxu2 }
 0x26b   : > { %v1812_v19 = vpop.f32.mrf.mxu3  ;;  %v2041_v52 = vpop.f32.mrf.mxu0  ;;  %v2188_v21 = vmul.f32 %v2117_v25, %v3947_v47 }
 0x26c   : > { %v3953_v42 = vmul.f32 %v1812_v19, %v1680_v58  ;;  %v2190_v23 = vmul.f32 %v2041_v52, %v3949_v56 }
 0x26e   : > { %v2080_v55 = vpop.f32.mrf.mxu1  ;;  %v2202_v17 = vadd.f32 %v2190_v23, %v2186_v13 }
 0x26f   : > { %v2191_v31 = vmul.f32 %v2080_v55, %v3951_v16 }
 0x271   : > { %v2211_v33 = vadd.f32 %v2191_v31, %v2187_v26 }
 0x272   : > { %v2119_v50 = vpop.f32.mrf.mxu2 }
 0x273   : > { %v1815_v29 = vpop.f32.mrf.mxu3  ;;  %v2044_v57 = vpop.f32.mrf.mxu0  ;;  %v2192_v3 = vmul.f32 %v2119_v50, %v3955_v11 }
 0x274   : > { %v3961_v36 = vmul.f32 %v1815_v29, %v1683_v37  ;;  %v2194_v58 = vmul.f32 %v2044_v57, %v3957_v8 }
 0x275   : > { %v2220_v15 = vadd.f32 %v2192_v3, %v2188_v21 }
 0x276   : > { %v2083_v61 = vpop.f32.mrf.mxu1  ;;  %v2203_v37 = vadd.f32 %v2202_v17, %v2194_v58 }
 0x277   : > { %v2195_v46 = vmul.f32 %v2083_v61, %v3959_v62 }
 0x279   : > { %v2212_v28 = vadd.f32 %v2211_v33, %v2195_v46 }
 0x27a   : > { %v2122_v1 = vpop.f32.mrf.mxu2 }
 0x27b   : > { %v1818_v59 = vpop.f32.mrf.mxu3  ;;  %v2046_v44 = vpop.f32.mrf.mxu0 }
 0x27c   : > { %v3969_v53 = vmul.f32 %v1818_v59, %v1686_v54  ;;  %v2196_v54 = vmul.f32 %v2122_v1, %v3963_v7  ;;  %v2198_v5 = vmul.f32 %v2046_v44, %v3965_v18 }
 0x27e   : > { %v2085_v51 = vpop.f32.mrf.mxu1  ;;  %v3988_v9 = vadd.f32 %v2203_v37, %v2198_v5 }
 0x27f   : > { %v2199_v45 = vmul.f32 %v2085_v51, %v3967_v4 }
 0x281   : > { %v3990_v38 = vadd.f32 %v2212_v28, %v2199_v45 }
 0x282   : > { %v2124_v39 = vpop.f32.mrf.mxu2 }
 0x283   : > { %v1821_v48 = vpop.f32.mrf.mxu3  ;;  %v2049_v34 = vpop.f32.mrf.mxu0  ;;  %v2200_v29 = vmul.f32 %v2124_v39, %v3971_v0 }
 0x284   : > { %v3975_v27 = vmul.f32 %v1821_v48, %v1689_v43  ;;  %v2221_v43 = vadd.f32 %v2220_v15, %v2196_v54  ;;  %v2238_v40 = vmul.f32 %v2049_v34, %v3943_v14 }
 0x286   : > { %v2088_v2 = vpop.f32.mrf.mxu1  ;;  %v3994_v22 = vadd.f32 %v2221_v43, %v2200_v29 }
 0x287   : > { %v2239_v25 = vmul.f32 %v2088_v2, %v3945_v12 }
 0x28a   : > { %v2127_v60 = vpop.f32.mrf.mxu2 }
 0x28b   : > { %v2156_v6 = vpop.f32.mrf.mxu3  ;;  %v2051_v24 = vpop.f32.mrf.mxu0  ;;  %v2240_v33 = vmul.f32 %v2127_v60, %v3947_v47 }
 0x28c   : > { %v2189_v10 = vmul.f32 %v2156_v6, %v3953_v42  ;;  %v2242_v26 = vmul.f32 %v2051_v24, %v3949_v56 }
 0x28e   : > { %v2090_v48 = vpop.f32.mrf.mxu1  ;;  %v2254_v21 = vadd.f32 %v2242_v26, %v2238_v40 }
 0x28f   : > { %v2243_v52 = vmul.f32 %v2090_v48, %v3951_v16 }
 0x291   : > { %v2263_v23 = vadd.f32 %v2243_v52, %v2239_v25 }
 0x292   : > { %v2129_v31 = vpop.f32.mrf.mxu2 }
 0x293   : > { %v2158_v41 = vpop.f32.mrf.mxu3  ;;  %v2054_v17 = vpop.f32.mrf.mxu0  ;;  %v2244_v6 = vmul.f32 %v2129_v31, %v3955_v11 }
 0x294   : > { %v2193_v63 = vmul.f32 %v2158_v41, %v3961_v36 }
 0x295   : > { %v2272_v3 = vadd.f32 %v2244_v6, %v2240_v33 }
 0x296   : > { %v2229_v32 = vadd.f32 %v2193_v63, %v2189_v10  ;;  %v2246_v10 = vmul.f32 %v2054_v17, %v3957_v8  ;;  %v2093_v50 = vpop.f32.mrf.mxu1  ;;  %v2205_v17 = vrot.slane %v3988_v9, 4 }
 0x297   : > { %v2247_v57 = vmul.f32 %v2093_v50, %v3959_v62 }
 0x298   : > { %v2255_v58 = vadd.f32 %v2254_v21, %v2246_v10 }
 0x299   : > { %v2264_v61 = vadd.f32 %v2263_v23, %v2247_v57 }
 0x29a   : > { %v2132_v28 = vpop.f32.mrf.mxu2 }
 0x29b   : > { %v2161_v30 = vpop.f32.mrf.mxu3  ;;  %v2056_v41 = vpop.f32.mrf.mxu0  ;;  %v2248_v1 = vmul.f32 %v2132_v28, %v3963_v7 }
 0x29c   : > { %v2197_v19 = vmul.f32 %v2161_v30, %v3969_v53  ;;  %v2250_v44 = vmul.f32 %v2056_v41, %v3965_v18 }
 0x29d   : > { %v2273_v5 = vadd.f32 %v2272_v3, %v2248_v1 }
 0x29e   : > { %v2230_v49 = vadd.f32 %v2229_v32, %v2197_v19  ;;  %v2095_v32 = vpop.f32.mrf.mxu1  ;;  %v2256_v51 = vadd.f32 %v2255_v58, %v2250_v44 }
 0x29f   : > { %v2251_v54 = vmul.f32 %v2095_v32, %v3967_v4 }
 0x2a0   : > { %v2257_v3 = vrot.slane %v2256_v51, 4 }
 0x2a1   : > { %v2265_v45 = vadd.f32 %v2264_v61, %v2251_v54 }
 0x2a2   : > { %v2134_v19 = vpop.f32.mrf.mxu2  ;;  %v2258_v28 = vadd.f32 %v2257_v3, %v2256_v51 }
 0x2a3   : > { %v2163_v20 = vpop.f32.mrf.mxu3  ;;  %v2059_v39 = vpop.f32.mrf.mxu0 }
 0x2a4   : > { %v2201_v59 = vmul.f32 %v2163_v20, %v3975_v27  ;;  %v2290_v26 = vmul.f32 %v2059_v39, %v3943_v14 }
 0x2a6   : > { %v3997_v13 = vadd.f32 %v2230_v49, %v2201_v59  ;;  %v2252_v49 = vmul.f32 %v2134_v19, %v3971_v0  ;;  %v2098_v29 = vpop.f32.mrf.mxu1 }
 0x2a7   : > { %v2291_v52 = vmul.f32 %v2098_v29, %v3945_v12 }
 0x2a8   : > { %v2274_v2 = vadd.f32 %v2273_v5, %v2252_v49 }
 0x2aa   : > { %v2137_v60 = vpop.f32.mrf.mxu2 }
 0x2ab   : > { %v2166_v55 = vpop.f32.mrf.mxu3  ;;  %v2061_v24 = vpop.f32.mrf.mxu0  ;;  %v2292_v10 = vmul.f32 %v2137_v60, %v3947_v47 }
 0x2ac   : > { %v2241_v15 = vmul.f32 %v2166_v55, %v3953_v42  ;;  %v2294_v48 = vmul.f32 %v2061_v24, %v3949_v56  ;;  %v2214_v56 = vrot.slane %v3990_v38, 4 }
 0x2ae   : > { %v2100_v25 = vpop.f32.mrf.mxu1  ;;  %v2306_v23 = vadd.f32 %v2294_v48, %v2290_v26  ;;  %v2232_v26 = vrot.slane %v3997_v13, 4 }
 0x2af   : > { %v2295_v21 = vmul.f32 %v2100_v25, %v3951_v16  ;;  %v2206_v16 = vadd.f32 %v2205_v17, %v3988_v9 }
 0x2b1   : > { %v2315_v55 = vadd.f32 %v2295_v21, %v2291_v52  ;;  %v2207_v41 = vrot.slane %v2206_v16, 2 }
 0x2b2   : > { %v2139_v33 = vpop.f32.mrf.mxu2 }
 0x2b3   : > { %v2168_v46 = vpop.f32.mrf.mxu3  ;;  %v2064_v6 = vpop.f32.mrf.mxu0  ;;  %v2296_v50 = vmul.f32 %v2139_v33, %v3955_v11  ;;  %v2208_v51 = vadd.f32 %v2207_v41, %v2206_v16 }
 0x2b4   : > { %v2245_v37 = vmul.f32 %v2168_v46, %v3961_v36  ;;  %v2298_v14 = vmul.f32 %v2064_v6, %v3957_v8  ;;  %v2266_v46 = vrot.slane %v2265_v45, 4 }
 0x2b5   : > { %v2324_v58 = vadd.f32 %v2296_v50, %v2292_v10 }
 0x2b6   : > { %v2281_v63 = vadd.f32 %v2245_v37, %v2241_v15  ;;  %v2103_v57 = vpop.f32.mrf.mxu1  ;;  %v2307_v61 = vadd.f32 %v2306_v23, %v2298_v14  ;;  %v2215_v37 = vadd.f32 %v2214_v56, %v3990_v38  ;;  %v2233_v56 = vadd.f32 %v2232_v26, %v3997_v13 }
 0x2b7   : > { %v2299_v12 = vmul.f32 %v2103_v57, %v3959_v62 }
 0x2b8   : > { %v2216_v5 = vrot.slane %v2215_v37, 2 }
 0x2b9   : > { %v2316_v15 = vadd.f32 %v2315_v55, %v2299_v12 }
 0x2ba   : > { %v2142_v1 = vpop.f32.mrf.mxu2  ;;  %v2217_v49 = vadd.f32 %v2216_v5, %v2215_v37 }
 0x2bb   : > { %v2171_v43 = vpop.f32.mrf.mxu3  ;;  %v2066_v44 = vpop.f32.mrf.mxu0  ;;  %v2300_v62 = vmul.f32 %v2142_v1, %v3963_v7 }
 0x2bc   : > { %v2249_v30 = vmul.f32 %v2171_v43, %v3969_v53  ;;  %v2302_v9 = vmul.f32 %v2066_v44, %v3965_v18  ;;  %v2259_v43 = vrot.slane %v2258_v28, 2  ;;  %v2218_v6 = vrot.slane %v2217_v49, 1 }
 0x2bd   : > { %v2325_v19 = vadd.f32 %v2324_v58, %v2300_v62  ;;  %v2234_v44 = vrot.slane %v2233_v56, 2 }
 0x2be   : > { %v2282_v34 = vadd.f32 %v2281_v63, %v2249_v30  ;;  %v2267_v63 = vadd.f32 %v2266_v46, %v2265_v45  ;;  %v2105_v54 = vpop.f32.mrf.mxu1  ;;  %v2275_v30 = vrot.slane %v2274_v2, 4  ;;  %v2308_v39 = vadd.f32 %v2307_v61, %v2302_v9 }
 0x2bf   : > { %v2303_v38 = vmul.f32 %v2105_v54, %v3967_v4  ;;  %v2260_v29 = vadd.f32 %v2259_v43, %v2258_v28 }
 0x2c0   : > { %v2276_v18 = vadd.f32 %v2275_v30, %v2274_v2 }
 0x2c1   : > { %v2317_v45 = vadd.f32 %v2316_v15, %v2303_v38  ;;  %v2261_v17 = vrot.slane %v2260_v29, 1 }
 0x2c2   : > { %v2144_v52 = vpop.f32.mrf.mxu2  ;;  %v2277_v2 = vrot.slane %v2276_v18, 2 }
 0x2c3   : > { %v2173_v20 = vpop.f32.mrf.mxu3  ;;  %v2318_v7 = vrot.slane %v2317_v45, 4  ;;  %v2262_v58 = vadd.f32 %v2261_v17, %v2260_v29 }
 0x2c4   : > { %v2253_v59 = vmul.f32 %v2173_v20, %v3975_v27  ;;  %v2278_v46 = vadd.f32 %v2277_v2, %v2276_v18 }
 0x2c5   : > { %v2319_v25 = vadd.f32 %v2318_v7, %v2317_v45 }
 0x2c6   : > { %v4015_v40 = vadd.f32 %v2282_v34, %v2253_v59  ;;  %v2309_v34 = vrot.slane %v2308_v39, 4  ;;  %v2209_v59 = vrot.slane %v2208_v51, 1 }
 0x2c7   : > { %v2320_v33 = vrot.slane %v2319_v25, 2 }
 0x2c8   : > { %v2310_v24 = vadd.f32 %v2309_v34, %v2308_v39  ;;  %v2284_v21 = vrot.slane %v4015_v40, 4  ;;  %v2210_v50 = vadd.f32 %v2209_v59, %v2208_v51  ;;  %v2235_v39 = vadd.f32 %v2234_v44, %v2233_v56 }
 0x2c9   : > { %v2321_v57 = vadd.f32 %v2320_v33, %v2319_v25 }
 0x2ca   : > { %v2311_v55 = vrot.slane %v2310_v24, 2  ;;  %v2285_v3 = vadd.f32 %v2284_v21, %v4015_v40  ;;  %v2236_v59 = vrot.slane %v2235_v39, 1 }
 0x2cb   : > { %v2176_v31 = vpop.f32.mrf.mxu3 }
 0x2cc   : > { %v2293_v11 = vmul.f32 %v2176_v31, %v3953_v42  ;;  %v2223_v42 = vrot.slane %v3994_v22, 4  ;;  %v2304_v31 = vmul.f32 %v2144_v52, %v3971_v0  ;;  %v2312_v10 = vadd.f32 %v2311_v55, %v2310_v24 }
 0x2cd   : > { %v2322_v0 = vrot.slane %v2321_v57, 1  ;;  %v2286_v40 = vrot.slane %v2285_v3, 2  ;;  %v2237_v26 = vadd.f32 %v2236_v59, %v2235_v39 }
 0x2ce   : > { %v2224_v4 = vadd.f32 %v2223_v42, %v3994_v22  ;;  %v2313_v12 = vrot.slane %v2312_v10, 1 }
 0x2cf   : > { %v2287_v51 = vadd.f32 %v2286_v40, %v2285_v3 }
 0x2d0   : > { %v2225_v14 = vrot.slane %v2224_v4, 2  ;;  %v2314_v15 = vadd.f32 %v2313_v12, %v2312_v10 }
 0x2d1   : > { %v2288_v29 = vrot.slane %v2287_v51, 1 }
 0x2d2   : > { %v2226_v41 = vadd.f32 %v2225_v14, %v2224_v4 }
 0x2d3   : > { %v2178_v47 = vpop.f32.mrf.mxu3  ;;  %v2289_v24 = vadd.f32 %v2288_v29, %v2287_v51 }
 0x2d4   : > { %v2297_v8 = vmul.f32 %v2178_v47, %v3961_v36  ;;  %v2268_v36 = vrot.slane %v2267_v63, 2  ;;  %v2219_v47 = vadd.f32 %v2218_v6, %v2217_v49  ;;  %v2227_v43 = vrot.slane %v2226_v41, 1 }
 0x2d6   : > { %v2333_v32 = vadd.f32 %v2297_v8, %v2293_v11  ;;  %v2269_v48 = vadd.f32 %v2268_v36, %v2267_v63  ;;  %v2323_v11 = vadd.f32 %v2322_v0, %v2321_v57  ;;  %v2344_v8 = vsel %vm2343_vm12, %v2262_v58, %v2314_v15 }
 0x2d7   : > { %v2228_v49 = vadd.f32 %v2227_v43, %v2226_v41 }
 0x2d8   : > { %v2270_v22 = vrot.slane %v2269_v48, 1 }
 0x2da   : > { %v2271_v13 = vadd.f32 %v2270_v22, %v2269_v48 }
 0x2db   : > { %v2181_v20 = vpop.f32.mrf.mxu3 }
 0x2dc   : > { %v2301_v60 = vmul.f32 %v2181_v20, %v3969_v53  ;;  %v2326_v53 = vadd.f32 %v2325_v19, %v2304_v31  ;;  %v2345_v62 = vsel %vm2343_vm12, %v2271_v13, %v2323_v11 }
 0x2dd   : > { %v2349_v9 = vsel %vm2342_vm11, %v2219_v47, %v2345_v62 }
 0x2de   : > { %v2334_v23 = vadd.f32 %v2333_v32, %v2301_v60  ;;  %v2327_v16 = vrot.slane %v2326_v53, 4  ;;  %v2348_v32 = vsel %vm2342_vm11, %v2210_v50, %v2344_v8  ;;  %v2356_v38 = vrot.slane %v2349_v9, 4 }
 0x2e0   : > { %v2328_v37 = vadd.f32 %v2327_v16, %v2326_v53  ;;  %v2359_v42 = vsel %vm2358_vm13, %v2348_v32, %v2356_v38 }
 0x2e1   : > { %2363 = vst [vmem:[%s268_s18] sm:$0x77] %v2359_v42 }
 0x2e2   : > { %v2329_v63 = vrot.slane %v2328_v37, 2 }
 0x2e3   : > { %v2183_v61 = vpop.f32.mrf.mxu3 }
 0x2e4   : > { %v2305_v28 = vmul.f32 %v2183_v61, %v3975_v27  ;;  %v2279_v27 = vrot.slane %v2278_v46, 1  ;;  %v2330_v54 = vadd.f32 %v2329_v63, %v2328_v37 }
 0x2e6   : > { %v2335_v1 = vadd.f32 %v2334_v23, %v2305_v28  ;;  %v2331_v30 = vrot.slane %v2330_v54, 1  ;;  %v2280_v36 = vadd.f32 %v2279_v27, %v2278_v46 }
 0x2e8   : > { %v2336_v5 = vrot.slane %v2335_v1, 4  ;;  %v2332_v45 = vadd.f32 %v2331_v30, %v2330_v54 }
 0x2ea   : > { %v2337_v19 = vadd.f32 %v2336_v5, %v2335_v1  ;;  %v2346_v20 = vsel %vm2343_vm12, %v2280_v36, %v2332_v45 }
 0x2eb   : > { %v2350_v18 = vsel %vm2342_vm11, %v2228_v49, %v2346_v20 }
 0x2ec   : > { %v2338_v34 = vrot.slane %v2337_v19, 2 }
 0x2ee   : > { %v2339_v7 = vadd.f32 %v2338_v34, %v2337_v19 }
 0x2f0   : > { %v2340_v60 = vrot.slane %v2339_v7, 1 }
 0x2f2   : > { %v2341_v4 = vadd.f32 %v2340_v60, %v2339_v7 }
 0x2f4   : > { %v2347_v48 = vsel %vm2343_vm12, %v2289_v24, %v2341_v4 }
 0x2f5   : > { %v2351_v25 = vsel %vm2342_vm11, %v2237_v26, %v2347_v48 }
 0x2f6   : > { %v2357_v52 = vrot.slane %v2351_v25, 4 }
 0x2f8   : > { %v2360_v21 = vsel %vm2358_vm13, %v2350_v18, %v2357_v52 }
 0x2f9   : > { %2364 = vst [vmem:[%s268_s18 + $0x8] sm:$0x77] %v2360_v21 }
 0x2fa PF: > { %s15_s20 = sadd.s32 1, %s2719_s20   ;;  %s4100_s18 = smov %s2715_s19 }
 0x2fb   : > { %p12_p5 = scmp.ge.s32.totalorder %s15_s20, 4   ;;  %s4101_s19 = smov %s4103_s21 }
 0x2fd   :  { %14 = sbr.rel (!%p12_p5) target bundleno = 2 (0x2), region = 73 }

</bundles_post_ra>
